<compile_context>
chip_gen: v7x
topology: tpu7x:2x2x1
jax: 0.10.0
libtpu: 0.0.40
codegen_flags: <defaults>
</compile_context>

<pallas_src>
import math

import jax
import jax.numpy as jnp
from jax.experimental import pallas as pl
from jax.experimental.pallas import tpu as pltpu

LANE = 128
BATCH_ALIGN = 16            # bf16 vregs pack (16, 128): round the batch to 16
BN_EPS = 1e-5
LEAKY_SLOPE = 0.2

ENC_HIDDEN = [32, 128, 256, 256, 64]
DEC_HIDDEN = [64, 256, 256, 128, 32]


def _round_up(x, m):
    return (x + m - 1) // m * m


# ---------------------------------------------------------------------------
# Fully fused autoencoder kernel (single invocation, everything VMEM-resident)
# ---------------------------------------------------------------------------
def _make_swae_kernel(layer_dims, act_flags, z_index, batch, batch_pad):
    n_layers = len(layer_dims)
    mask_rows = batch_pad != batch
    inv_b = 1.0 / float(batch)

    def kernel(x_ref, w_ref, b_ref, z_ref, xrec_ref):
        h = x_ref[...].astype(jnp.float32)

        if mask_rows:
            row_ids = jax.lax.broadcasted_iota(jnp.int32, (batch_pad, 1), 0)
            row_mask = (row_ids < batch).astype(jnp.float32)

        for i in range(n_layers):
            din_p, dout_p = layer_dims[i]

            # --- BatchNorm1d statistics (training mode), one pass ----------
            # Pad rows of h are exactly zero, so unmasked sums == sums over
            # the real batch rows.
            s1 = jnp.sum(h, axis=0, keepdims=True)
            s2 = jnp.sum(h * h, axis=0, keepdims=True)
            mean = s1 * inv_b
            var = jnp.maximum(s2 * inv_b - mean * mean, 0.0)
            h_n = (h - mean) * jax.lax.rsqrt(var + BN_EPS)

            # --- Linear with folded BN affine: bf16 MXU inputs, f32 acc ----
            # Static, 128-aligned slices of the stacked weight/bias tensors.
            w_i = w_ref[i, :din_p, :dout_p]          # (din_p, dout_p) bf16
            b_i = b_ref[i, :, :dout_p]               # (1, dout_p) f32
            y = jnp.dot(h_n.astype(jnp.bfloat16), w_i,
                        preferred_element_type=jnp.float32)
            y = y + b_i

            # --- LeakyReLU(0.2) on hidden layers only (f32 elementwise) ----
            if act_flags[i]:
                y = jnp.where(y >= 0.0, y, LEAKY_SLOPE * y)

            # Keep pad rows exactly zero so the next layer's one-pass stats
            # need no masking (single multiply per layer).
            if mask_rows and i < n_layers - 1:
                y = y * row_mask

            h = y
            if i == z_index:
                z_ref[...] = h

        xrec_ref[...] = h

    return kernel


# ---------------------------------------------------------------------------
# Parameter construction (PyTorch-default init shapes/distributions)
# ---------------------------------------------------------------------------
def init_mlp_params(key, dims):
    """One (gamma, beta, W, b) tuple per BN->Linear block (f32, unpadded)."""
    params = []
    for i in range(len(dims) - 1):
        din, dout = dims[i], dims[i + 1]
        key, kw, kb = jax.random.split(key, 3)
        gamma = jnp.ones((din,), jnp.float32)      # BatchNorm1d weight
        beta = jnp.zeros((din,), jnp.float32)      # BatchNorm1d bias
        bound = 1.0 / math.sqrt(din)                # nn.Linear default init
        w = jax.random.uniform(kw, (din, dout), jnp.float32, -bound, bound)
        b = jax.random.uniform(kb, (dout,), jnp.float32, -bound, bound)
        params.append((gamma, beta, w, b))
    return key, params


def init_swae_params(key, in_dim, inter_dim):
    enc_dims = [in_dim] + ENC_HIDDEN + [inter_dim]
    dec_dims = [inter_dim] + DEC_HIDDEN + [in_dim]
    key, enc = init_mlp_params(key, enc_dims)
    key, dec = init_mlp_params(key, dec_dims)
    return enc, dec


def _stack_folded_params(params, max_din_p, max_dout_p):
    """Fold BN affine into Linear and stack all layers into 2 operands.

    W' = gamma[:, None] * W  (zero-padded, bf16)
    b' = b + beta @ W        (zero-padded, f32)
    Padding is exact: padded rows/cols of W' and padded lanes of b' are zero.
    """
    n = len(params)
    w_all = jnp.zeros((n, max_din_p, max_dout_p), jnp.float32)
    b_all = jnp.zeros((n, 1, max_dout_p), jnp.float32)
    for i, (gamma, beta, w, b) in enumerate(params):
        din, dout = w.shape
        w_f = gamma[:, None] * w
        b_f = b + beta @ w
        w_all = w_all.at[i, :din, :dout].set(w_f)
        b_all = b_all.at[i, 0, :dout].set(b_f)
    return w_all.astype(jnp.bfloat16), b_all


# ---------------------------------------------------------------------------
# Forward wrapper: one pallas_call for the whole encoder + decoder
# ---------------------------------------------------------------------------
def swautoencoder_forward(x, enc_params, dec_params):
    B, in_dim = x.shape
    inter_dim = enc_params[-1][2].shape[1]
    out_dim = dec_params[-1][2].shape[1]

    all_params = list(enc_params) + list(dec_params)
    n_layers = len(all_params)
    act_flags = tuple([True] * (len(enc_params) - 1) + [False]
                      + [True] * (len(dec_params) - 1) + [False])
    z_index = len(enc_params) - 1

    B_pad = _round_up(B, BATCH_ALIGN)
    d0_pad = _round_up(in_dim, LANE)
    layer_dims = [(_round_up(w.shape[0], LANE), _round_up(w.shape[1], LANE))
                  for (_, _, w, _) in all_params]
    max_din_p = max(d for d, _ in layer_dims)
    max_dout_p = max(d for _, d in layer_dims)
    z_pad = layer_dims[z_index][1]
    out_pad = layer_dims[-1][1]

    # 3 operands total (x, stacked folded weights, stacked folded biases)
    # instead of 49 individual tiny DMAs.
    w_all, b_all = _stack_folded_params(all_params, max_din_p, max_dout_p)
    x_p = jnp.pad(x.astype(jnp.float32), ((0, B_pad - B), (0, d0_pad - in_dim)))
    operands = [x_p, w_all, b_all]

    full = lambda shape: pl.BlockSpec(shape, lambda: (0,) * len(shape))
    in_specs = [full(op.shape) for op in operands]
    out_shapes = (jax.ShapeDtypeStruct((B_pad, z_pad), jnp.float32),
                  jax.ShapeDtypeStruct((B_pad, out_pad), jnp.float32))
    out_specs = (full((B_pad, z_pad)), full((B_pad, out_pad)))

    # VMEM budget: operands + outputs (x2 for Pallas buffering) plus the live
    # in-kernel f32 activation temporaries (~8 buffers of (B_pad, max_width)),
    # capped at 48 MiB so the request stays safe on v7x (64 MiB physical).
    operand_bytes = sum(int(op.size) * op.dtype.itemsize for op in operands)
    out_bytes = B_pad * (z_pad + out_pad) * 4
    temp_bytes = 8 * B_pad * max_dout_p * 4
    vmem_limit = min(2 * (operand_bytes + out_bytes) + temp_bytes + (4 << 20),
                     48 << 20)

    kernel = _make_swae_kernel(layer_dims, act_flags, z_index, B, B_pad)

    z_p, xrec_p = pl.pallas_call(
        kernel,
        out_shape=out_shapes,
        grid=(),
        in_specs=in_specs,
        out_specs=out_specs,
        compiler_params=pltpu.CompilerParams(vmem_limit_bytes=vmem_limit),
    )(*operands)

    return z_p[:B, :inter_dim], xrec_p[:B, :out_dim]


# ---------------------------------------------------------------------------
# Pure-JAX reference mirroring the kernel math exactly (folded BN affine,
# one-pass stats, bf16 MXU inputs, f32 accumulation).
# ---------------------------------------------------------------------------
def swautoencoder_forward_ref(x, enc_params, dec_params):
    def fold(params):
        folded = []
        for gamma, beta, w, b in params:
            folded.append(((gamma[:, None] * w).astype(jnp.bfloat16),
                           b + beta @ w))
        return folded

    def run_mlp(h, layers):
        n = len(layers)
        inv_b = 1.0 / h.shape[0]
        for i, (w, b) in enumerate(layers):
            s1 = jnp.sum(h, axis=0, keepdims=True)
            s2 = jnp.sum(h * h, axis=0, keepdims=True)
            mean = s1 * inv_b
            var = jnp.maximum(s2 * inv_b - mean * mean, 0.0)
            h_n = (h - mean) * jax.lax.rsqrt(var + BN_EPS)
            y = jnp.dot(h_n.astype(jnp.bfloat16), w,
                        preferred_element_type=jnp.float32) + b
            if i < n - 1:
                y = jnp.where(y >= 0.0, y, LEAKY_SLOPE * y)
            h = y
        return h

    z = run_mlp(x.astype(jnp.float32), fold(enc_params))
    x_rec = run_mlp(z, fold(dec_params))
    return z, x_rec


if __name__ == "__main__":
    # SWAutoEncoder(in_dim=16, inter_dim=8), batch = 8.
    in_dim, inter_dim = 16, 8
    batch = 8

    key = jax.random.PRNGKey(0)
    key, kx = jax.random.split(key)
    x = jax.random.normal(kx, (batch, in_dim), jnp.float32)

    enc_params, dec_params = init_swae_params(key, in_dim, inter_dim)

    fwd = jax.jit(swautoencoder_forward)
    z, x_rec = fwd(x, enc_params, dec_params)
    z, x_rec = jax.block_until_ready((z, x_rec))

    z_ref, xrec_ref = swautoencoder_forward_ref(x, enc_params, dec_params)

    assert z.shape == (batch, inter_dim)
    assert x_rec.shape == (batch, in_dim)
    assert jnp.allclose(z, z_ref, atol=2e-3, rtol=2e-3), "z mismatch vs reference"
    assert jnp.allclose(x_rec, xrec_ref, atol=2e-3, rtol=2e-3), "x_rec mismatch vs reference"

    print("KERNEL_OK")
</pallas_src>

<mosaic_0001>
module attributes {stable_mosaic.version = 11 : i64} {
  func.func @kernel(%arg0: memref<16x128xf32, #tpu.memory_space<vmem>>, %arg1: memref<12x256x256xbf16, #tpu.memory_space<vmem>>, %arg2: memref<12x1x256xf32, #tpu.memory_space<vmem>>, %arg3: memref<16x128xf32, #tpu.memory_space<vmem>>, %arg4: memref<16x128xf32, #tpu.memory_space<vmem>>) attributes {dimension_semantics = [], scalar_prefetch = 0 : i64, scratch_operands = 0 : i64, tpu.core_type = #tpu.core_type<tc>} {
    %c0 = arith.constant 0 : index
    %c0_0 = arith.constant 0 : index
    %0 = vector.load %arg0[%c0, %c0_0] : memref<16x128xf32, #tpu.memory_space<vmem>>, vector<16x128xf32>
    %1 = tpu.iota {dimensions = array<i32: 0>} : vector<16x1xi32>
    %c8_i32 = arith.constant 8 : i32
    %2 = vector.broadcast %c8_i32 : i32 to vector<16x1xi32>
    %3 = arith.cmpi slt, %1, %2 : vector<16x1xi32>
    %4 = arith.extui %3 : vector<16x1xi1> to vector<16x1xi32>
    %5 = arith.sitofp %4 : vector<16x1xi32> to vector<16x1xf32>
    %cst = arith.constant dense<0.000000e+00> : vector<128xf32>
    %6 = vector.multi_reduction <add>, %0, %cst [0] : vector<16x128xf32> to vector<128xf32>
    %7 = vector.shape_cast %6 : vector<128xf32> to vector<1x128xf32>
    %8 = arith.mulf %0, %0 : vector<16x128xf32>
    %cst_1 = arith.constant dense<0.000000e+00> : vector<128xf32>
    %9 = vector.multi_reduction <add>, %8, %cst_1 [0] : vector<16x128xf32> to vector<128xf32>
    %10 = vector.shape_cast %9 : vector<128xf32> to vector<1x128xf32>
    %cst_2 = arith.constant 1.250000e-01 : f32
    %11 = vector.broadcast %cst_2 : f32 to vector<1x128xf32>
    %12 = arith.mulf %7, %11 : vector<1x128xf32>
    %cst_3 = arith.constant 1.250000e-01 : f32
    %13 = vector.broadcast %cst_3 : f32 to vector<1x128xf32>
    %14 = arith.mulf %10, %13 : vector<1x128xf32>
    %15 = arith.mulf %12, %12 : vector<1x128xf32>
    %16 = arith.subf %14, %15 : vector<1x128xf32>
    %cst_4 = arith.constant 0.000000e+00 : f32
    %17 = vector.broadcast %cst_4 : f32 to vector<1x128xf32>
    %18 = arith.maximumf %16, %17 : vector<1x128xf32>
    %19 = vector.broadcast %12 : vector<1x128xf32> to vector<16x128xf32>
    %20 = arith.subf %0, %19 : vector<16x128xf32>
    %cst_5 = arith.constant 9.99999974E-6 : f32
    %21 = vector.broadcast %cst_5 : f32 to vector<1x128xf32>
    %22 = arith.addf %18, %21 : vector<1x128xf32>
    %23 = math.rsqrt %22 : vector<1x128xf32>
    %24 = vector.broadcast %23 : vector<1x128xf32> to vector<16x128xf32>
    %25 = arith.mulf %20, %24 : vector<16x128xf32>
    %c0_6 = arith.constant 0 : index
    %c0_7 = arith.constant 0 : index
    %c0_8 = arith.constant 0 : index
    %26 = vector.load %arg1[%c0_6, %c0_7, %c0_8] : memref<12x256x256xbf16, #tpu.memory_space<vmem>>, vector<1x128x128xbf16>
    %27 = vector.shape_cast %26 : vector<1x128x128xbf16> to vector<128x128xbf16>
    %c0_9 = arith.constant 0 : index
    %c0_10 = arith.constant 0 : index
    %c0_11 = arith.constant 0 : index
    %28 = vector.load %arg2[%c0_9, %c0_10, %c0_11] : memref<12x1x256xf32, #tpu.memory_space<vmem>>, vector<1x1x128xf32>
    %29 = vector.shape_cast %28 : vector<1x1x128xf32> to vector<1x128xf32>
    %30 = arith.truncf %25 : vector<16x128xf32> to vector<16x128xbf16>
    %cst_12 = arith.constant dense<0.000000e+00> : vector<16x128xf32>
    %31 = tpu.matmul %30, %27, %cst_12 {dimension_numbers = #tpu.dot_dimension_numbers<[1], [0], [0], [1], [0, 0, 1, 1], [], []>} : vector<16x128xbf16>, vector<128x128xbf16>, vector<16x128xf32> -> vector<16x128xf32>
    %32 = vector.broadcast %29 : vector<1x128xf32> to vector<16x128xf32>
    %33 = arith.addf %31, %32 : vector<16x128xf32>
    %cst_13 = arith.constant 0.000000e+00 : f32
    %34 = vector.broadcast %cst_13 : f32 to vector<16x128xf32>
    %35 = arith.cmpf oge, %33, %34 : vector<16x128xf32>
    %cst_14 = arith.constant 2.000000e-01 : f32
    %36 = vector.broadcast %cst_14 : f32 to vector<16x128xf32>
    %37 = arith.mulf %36, %33 : vector<16x128xf32>
    %38 = arith.select %35, %33, %37 : vector<16x128xi1>, vector<16x128xf32>
    %39 = vector.broadcast %5 : vector<16x1xf32> to vector<16x128xf32>
    %40 = arith.mulf %38, %39 : vector<16x128xf32>
    %cst_15 = arith.constant dense<0.000000e+00> : vector<128xf32>
    %41 = vector.multi_reduction <add>, %40, %cst_15 [0] : vector<16x128xf32> to vector<128xf32>
    %42 = vector.shape_cast %41 : vector<128xf32> to vector<1x128xf32>
    %43 = arith.mulf %40, %40 : vector<16x128xf32>
    %cst_16 = arith.constant dense<0.000000e+00> : vector<128xf32>
    %44 = vector.multi_reduction <add>, %43, %cst_16 [0] : vector<16x128xf32> to vector<128xf32>
    %45 = vector.shape_cast %44 : vector<128xf32> to vector<1x128xf32>
    %cst_17 = arith.constant 1.250000e-01 : f32
    %46 = vector.broadcast %cst_17 : f32 to vector<1x128xf32>
    %47 = arith.mulf %42, %46 : vector<1x128xf32>
    %cst_18 = arith.constant 1.250000e-01 : f32
    %48 = vector.broadcast %cst_18 : f32 to vector<1x128xf32>
    %49 = arith.mulf %45, %48 : vector<1x128xf32>
    %50 = arith.mulf %47, %47 : vector<1x128xf32>
    %51 = arith.subf %49, %50 : vector<1x128xf32>
    %cst_19 = arith.constant 0.000000e+00 : f32
    %52 = vector.broadcast %cst_19 : f32 to vector<1x128xf32>
    %53 = arith.maximumf %51, %52 : vector<1x128xf32>
    %54 = vector.broadcast %47 : vector<1x128xf32> to vector<16x128xf32>
    %55 = arith.subf %40, %54 : vector<16x128xf32>
    %cst_20 = arith.constant 9.99999974E-6 : f32
    %56 = vector.broadcast %cst_20 : f32 to vector<1x128xf32>
    %57 = arith.addf %53, %56 : vector<1x128xf32>
    %58 = math.rsqrt %57 : vector<1x128xf32>
    %59 = vector.broadcast %58 : vector<1x128xf32> to vector<16x128xf32>
    %60 = arith.mulf %55, %59 : vector<16x128xf32>
    %c1 = arith.constant 1 : index
    %c0_21 = arith.constant 0 : index
    %c0_22 = arith.constant 0 : index
    %61 = vector.load %arg1[%c1, %c0_21, %c0_22] : memref<12x256x256xbf16, #tpu.memory_space<vmem>>, vector<1x128x128xbf16>
    %62 = vector.shape_cast %61 : vector<1x128x128xbf16> to vector<128x128xbf16>
    %c1_23 = arith.constant 1 : index
    %c0_24 = arith.constant 0 : index
    %c0_25 = arith.constant 0 : index
    %63 = vector.load %arg2[%c1_23, %c0_24, %c0_25] : memref<12x1x256xf32, #tpu.memory_space<vmem>>, vector<1x1x128xf32>
    %64 = vector.shape_cast %63 : vector<1x1x128xf32> to vector<1x128xf32>
    %65 = arith.truncf %60 : vector<16x128xf32> to vector<16x128xbf16>
    %cst_26 = arith.constant dense<0.000000e+00> : vector<16x128xf32>
    %66 = tpu.matmul %65, %62, %cst_26 {dimension_numbers = #tpu.dot_dimension_numbers<[1], [0], [0], [1], [0, 0, 1, 1], [], []>} : vector<16x128xbf16>, vector<128x128xbf16>, vector<16x128xf32> -> vector<16x128xf32>
    %67 = vector.broadcast %64 : vector<1x128xf32> to vector<16x128xf32>
    %68 = arith.addf %66, %67 : vector<16x128xf32>
    %cst_27 = arith.constant 0.000000e+00 : f32
    %69 = vector.broadcast %cst_27 : f32 to vector<16x128xf32>
    %70 = arith.cmpf oge, %68, %69 : vector<16x128xf32>
    %cst_28 = arith.constant 2.000000e-01 : f32
    %71 = vector.broadcast %cst_28 : f32 to vector<16x128xf32>
    %72 = arith.mulf %71, %68 : vector<16x128xf32>
    %73 = arith.select %70, %68, %72 : vector<16x128xi1>, vector<16x128xf32>
    %74 = vector.broadcast %5 : vector<16x1xf32> to vector<16x128xf32>
    %75 = arith.mulf %73, %74 : vector<16x128xf32>
    %cst_29 = arith.constant dense<0.000000e+00> : vector<128xf32>
    %76 = vector.multi_reduction <add>, %75, %cst_29 [0] : vector<16x128xf32> to vector<128xf32>
    %77 = vector.shape_cast %76 : vector<128xf32> to vector<1x128xf32>
    %78 = arith.mulf %75, %75 : vector<16x128xf32>
    %cst_30 = arith.constant dense<0.000000e+00> : vector<128xf32>
    %79 = vector.multi_reduction <add>, %78, %cst_30 [0] : vector<16x128xf32> to vector<128xf32>
    %80 = vector.shape_cast %79 : vector<128xf32> to vector<1x128xf32>
    %cst_31 = arith.constant 1.250000e-01 : f32
    %81 = vector.broadcast %cst_31 : f32 to vector<1x128xf32>
    %82 = arith.mulf %77, %81 : vector<1x128xf32>
    %cst_32 = arith.constant 1.250000e-01 : f32
    %83 = vector.broadcast %cst_32 : f32 to vector<1x128xf32>
    %84 = arith.mulf %80, %83 : vector<1x128xf32>
    %85 = arith.mulf %82, %82 : vector<1x128xf32>
    %86 = arith.subf %84, %85 : vector<1x128xf32>
    %cst_33 = arith.constant 0.000000e+00 : f32
    %87 = vector.broadcast %cst_33 : f32 to vector<1x128xf32>
    %88 = arith.maximumf %86, %87 : vector<1x128xf32>
    %89 = vector.broadcast %82 : vector<1x128xf32> to vector<16x128xf32>
    %90 = arith.subf %75, %89 : vector<16x128xf32>
    %cst_34 = arith.constant 9.99999974E-6 : f32
    %91 = vector.broadcast %cst_34 : f32 to vector<1x128xf32>
    %92 = arith.addf %88, %91 : vector<1x128xf32>
    %93 = math.rsqrt %92 : vector<1x128xf32>
    %94 = vector.broadcast %93 : vector<1x128xf32> to vector<16x128xf32>
    %95 = arith.mulf %90, %94 : vector<16x128xf32>
    %c2 = arith.constant 2 : index
    %c0_35 = arith.constant 0 : index
    %c0_36 = arith.constant 0 : index
    %96 = vector.load %arg1[%c2, %c0_35, %c0_36] : memref<12x256x256xbf16, #tpu.memory_space<vmem>>, vector<1x128x256xbf16>
    %97 = vector.shape_cast %96 : vector<1x128x256xbf16> to vector<128x256xbf16>
    %c2_37 = arith.constant 2 : index
    %c0_38 = arith.constant 0 : index
    %c0_39 = arith.constant 0 : index
    %98 = vector.load %arg2[%c2_37, %c0_38, %c0_39] : memref<12x1x256xf32, #tpu.memory_space<vmem>>, vector<1x1x256xf32>
    %99 = vector.shape_cast %98 : vector<1x1x256xf32> to vector<1x256xf32>
    %100 = arith.truncf %95 : vector<16x128xf32> to vector<16x128xbf16>
    %cst_40 = arith.constant dense<0.000000e+00> : vector<16x256xf32>
    %101 = tpu.matmul %100, %97, %cst_40 {dimension_numbers = #tpu.dot_dimension_numbers<[1], [0], [0], [1], [0, 0, 1, 1], [], []>} : vector<16x128xbf16>, vector<128x256xbf16>, vector<16x256xf32> -> vector<16x256xf32>
    %102 = vector.broadcast %99 : vector<1x256xf32> to vector<16x256xf32>
    %103 = arith.addf %101, %102 : vector<16x256xf32>
    %cst_41 = arith.constant 0.000000e+00 : f32
    %104 = vector.broadcast %cst_41 : f32 to vector<16x256xf32>
    %105 = arith.cmpf oge, %103, %104 : vector<16x256xf32>
    %cst_42 = arith.constant 2.000000e-01 : f32
    %106 = vector.broadcast %cst_42 : f32 to vector<16x256xf32>
    %107 = arith.mulf %106, %103 : vector<16x256xf32>
    %108 = arith.select %105, %103, %107 : vector<16x256xi1>, vector<16x256xf32>
    %109 = vector.broadcast %5 : vector<16x1xf32> to vector<16x256xf32>
    %110 = arith.mulf %108, %109 : vector<16x256xf32>
    %cst_43 = arith.constant dense<0.000000e+00> : vector<256xf32>
    %111 = vector.multi_reduction <add>, %110, %cst_43 [0] : vector<16x256xf32> to vector<256xf32>
    %112 = vector.shape_cast %111 : vector<256xf32> to vector<1x256xf32>
    %113 = arith.mulf %110, %110 : vector<16x256xf32>
    %cst_44 = arith.constant dense<0.000000e+00> : vector<256xf32>
    %114 = vector.multi_reduction <add>, %113, %cst_44 [0] : vector<16x256xf32> to vector<256xf32>
    %115 = vector.shape_cast %114 : vector<256xf32> to vector<1x256xf32>
    %cst_45 = arith.constant 1.250000e-01 : f32
    %116 = vector.broadcast %cst_45 : f32 to vector<1x256xf32>
    %117 = arith.mulf %112, %116 : vector<1x256xf32>
    %cst_46 = arith.constant 1.250000e-01 : f32
    %118 = vector.broadcast %cst_46 : f32 to vector<1x256xf32>
    %119 = arith.mulf %115, %118 : vector<1x256xf32>
    %120 = arith.mulf %117, %117 : vector<1x256xf32>
    %121 = arith.subf %119, %120 : vector<1x256xf32>
    %cst_47 = arith.constant 0.000000e+00 : f32
    %122 = vector.broadcast %cst_47 : f32 to vector<1x256xf32>
    %123 = arith.maximumf %121, %122 : vector<1x256xf32>
    %124 = vector.broadcast %117 : vector<1x256xf32> to vector<16x256xf32>
    %125 = arith.subf %110, %124 : vector<16x256xf32>
    %cst_48 = arith.constant 9.99999974E-6 : f32
    %126 = vector.broadcast %cst_48 : f32 to vector<1x256xf32>
    %127 = arith.addf %123, %126 : vector<1x256xf32>
    %128 = math.rsqrt %127 : vector<1x256xf32>
    %129 = vector.broadcast %128 : vector<1x256xf32> to vector<16x256xf32>
    %130 = arith.mulf %125, %129 : vector<16x256xf32>
    %c3 = arith.constant 3 : index
    %c0_49 = arith.constant 0 : index
    %c0_50 = arith.constant 0 : index
    %131 = vector.load %arg1[%c3, %c0_49, %c0_50] : memref<12x256x256xbf16, #tpu.memory_space<vmem>>, vector<1x256x256xbf16>
    %132 = vector.shape_cast %131 : vector<1x256x256xbf16> to vector<256x256xbf16>
    %c3_51 = arith.constant 3 : index
    %c0_52 = arith.constant 0 : index
    %c0_53 = arith.constant 0 : index
    %133 = vector.load %arg2[%c3_51, %c0_52, %c0_53] : memref<12x1x256xf32, #tpu.memory_space<vmem>>, vector<1x1x256xf32>
    %134 = vector.shape_cast %133 : vector<1x1x256xf32> to vector<1x256xf32>
    %135 = arith.truncf %130 : vector<16x256xf32> to vector<16x256xbf16>
    %cst_54 = arith.constant dense<0.000000e+00> : vector<16x256xf32>
    %136 = tpu.matmul %135, %132, %cst_54 {dimension_numbers = #tpu.dot_dimension_numbers<[1], [0], [0], [1], [0, 0, 1, 1], [], []>} : vector<16x256xbf16>, vector<256x256xbf16>, vector<16x256xf32> -> vector<16x256xf32>
    %137 = vector.broadcast %134 : vector<1x256xf32> to vector<16x256xf32>
    %138 = arith.addf %136, %137 : vector<16x256xf32>
    %cst_55 = arith.constant 0.000000e+00 : f32
    %139 = vector.broadcast %cst_55 : f32 to vector<16x256xf32>
    %140 = arith.cmpf oge, %138, %139 : vector<16x256xf32>
    %cst_56 = arith.constant 2.000000e-01 : f32
    %141 = vector.broadcast %cst_56 : f32 to vector<16x256xf32>
    %142 = arith.mulf %141, %138 : vector<16x256xf32>
    %143 = arith.select %140, %138, %142 : vector<16x256xi1>, vector<16x256xf32>
    %144 = vector.broadcast %5 : vector<16x1xf32> to vector<16x256xf32>
    %145 = arith.mulf %143, %144 : vector<16x256xf32>
    %cst_57 = arith.constant dense<0.000000e+00> : vector<256xf32>
    %146 = vector.multi_reduction <add>, %145, %cst_57 [0] : vector<16x256xf32> to vector<256xf32>
    %147 = vector.shape_cast %146 : vector<256xf32> to vector<1x256xf32>
    %148 = arith.mulf %145, %145 : vector<16x256xf32>
    %cst_58 = arith.constant dense<0.000000e+00> : vector<256xf32>
    %149 = vector.multi_reduction <add>, %148, %cst_58 [0] : vector<16x256xf32> to vector<256xf32>
    %150 = vector.shape_cast %149 : vector<256xf32> to vector<1x256xf32>
    %cst_59 = arith.constant 1.250000e-01 : f32
    %151 = vector.broadcast %cst_59 : f32 to vector<1x256xf32>
    %152 = arith.mulf %147, %151 : vector<1x256xf32>
    %cst_60 = arith.constant 1.250000e-01 : f32
    %153 = vector.broadcast %cst_60 : f32 to vector<1x256xf32>
    %154 = arith.mulf %150, %153 : vector<1x256xf32>
    %155 = arith.mulf %152, %152 : vector<1x256xf32>
    %156 = arith.subf %154, %155 : vector<1x256xf32>
    %cst_61 = arith.constant 0.000000e+00 : f32
    %157 = vector.broadcast %cst_61 : f32 to vector<1x256xf32>
    %158 = arith.maximumf %156, %157 : vector<1x256xf32>
    %159 = vector.broadcast %152 : vector<1x256xf32> to vector<16x256xf32>
    %160 = arith.subf %145, %159 : vector<16x256xf32>
    %cst_62 = arith.constant 9.99999974E-6 : f32
    %161 = vector.broadcast %cst_62 : f32 to vector<1x256xf32>
    %162 = arith.addf %158, %161 : vector<1x256xf32>
    %163 = math.rsqrt %162 : vector<1x256xf32>
    %164 = vector.broadcast %163 : vector<1x256xf32> to vector<16x256xf32>
    %165 = arith.mulf %160, %164 : vector<16x256xf32>
    %c4 = arith.constant 4 : index
    %c0_63 = arith.constant 0 : index
    %c0_64 = arith.constant 0 : index
    %166 = vector.load %arg1[%c4, %c0_63, %c0_64] : memref<12x256x256xbf16, #tpu.memory_space<vmem>>, vector<1x256x128xbf16>
    %167 = vector.shape_cast %166 : vector<1x256x128xbf16> to vector<256x128xbf16>
    %c4_65 = arith.constant 4 : index
    %c0_66 = arith.constant 0 : index
    %c0_67 = arith.constant 0 : index
    %168 = vector.load %arg2[%c4_65, %c0_66, %c0_67] : memref<12x1x256xf32, #tpu.memory_space<vmem>>, vector<1x1x128xf32>
    %169 = vector.shape_cast %168 : vector<1x1x128xf32> to vector<1x128xf32>
    %170 = arith.truncf %165 : vector<16x256xf32> to vector<16x256xbf16>
    %cst_68 = arith.constant dense<0.000000e+00> : vector<16x128xf32>
    %171 = tpu.matmul %170, %167, %cst_68 {dimension_numbers = #tpu.dot_dimension_numbers<[1], [0], [0], [1], [0, 0, 1, 1], [], []>} : vector<16x256xbf16>, vector<256x128xbf16>, vector<16x128xf32> -> vector<16x128xf32>
    %172 = vector.broadcast %169 : vector<1x128xf32> to vector<16x128xf32>
    %173 = arith.addf %171, %172 : vector<16x128xf32>
    %cst_69 = arith.constant 0.000000e+00 : f32
    %174 = vector.broadcast %cst_69 : f32 to vector<16x128xf32>
    %175 = arith.cmpf oge, %173, %174 : vector<16x128xf32>
    %cst_70 = arith.constant 2.000000e-01 : f32
    %176 = vector.broadcast %cst_70 : f32 to vector<16x128xf32>
    %177 = arith.mulf %176, %173 : vector<16x128xf32>
    %178 = arith.select %175, %173, %177 : vector<16x128xi1>, vector<16x128xf32>
    %179 = vector.broadcast %5 : vector<16x1xf32> to vector<16x128xf32>
    %180 = arith.mulf %178, %179 : vector<16x128xf32>
    %cst_71 = arith.constant dense<0.000000e+00> : vector<128xf32>
    %181 = vector.multi_reduction <add>, %180, %cst_71 [0] : vector<16x128xf32> to vector<128xf32>
    %182 = vector.shape_cast %181 : vector<128xf32> to vector<1x128xf32>
    %183 = arith.mulf %180, %180 : vector<16x128xf32>
    %cst_72 = arith.constant dense<0.000000e+00> : vector<128xf32>
    %184 = vector.multi_reduction <add>, %183, %cst_72 [0] : vector<16x128xf32> to vector<128xf32>
    %185 = vector.shape_cast %184 : vector<128xf32> to vector<1x128xf32>
    %cst_73 = arith.constant 1.250000e-01 : f32
    %186 = vector.broadcast %cst_73 : f32 to vector<1x128xf32>
    %187 = arith.mulf %182, %186 : vector<1x128xf32>
    %cst_74 = arith.constant 1.250000e-01 : f32
    %188 = vector.broadcast %cst_74 : f32 to vector<1x128xf32>
    %189 = arith.mulf %185, %188 : vector<1x128xf32>
    %190 = arith.mulf %187, %187 : vector<1x128xf32>
    %191 = arith.subf %189, %190 : vector<1x128xf32>
    %cst_75 = arith.constant 0.000000e+00 : f32
    %192 = vector.broadcast %cst_75 : f32 to vector<1x128xf32>
    %193 = arith.maximumf %191, %192 : vector<1x128xf32>
    %194 = vector.broadcast %187 : vector<1x128xf32> to vector<16x128xf32>
    %195 = arith.subf %180, %194 : vector<16x128xf32>
    %cst_76 = arith.constant 9.99999974E-6 : f32
    %196 = vector.broadcast %cst_76 : f32 to vector<1x128xf32>
    %197 = arith.addf %193, %196 : vector<1x128xf32>
    %198 = math.rsqrt %197 : vector<1x128xf32>
    %199 = vector.broadcast %198 : vector<1x128xf32> to vector<16x128xf32>
    %200 = arith.mulf %195, %199 : vector<16x128xf32>
    %c5 = arith.constant 5 : index
    %c0_77 = arith.constant 0 : index
    %c0_78 = arith.constant 0 : index
    %201 = vector.load %arg1[%c5, %c0_77, %c0_78] : memref<12x256x256xbf16, #tpu.memory_space<vmem>>, vector<1x128x128xbf16>
    %202 = vector.shape_cast %201 : vector<1x128x128xbf16> to vector<128x128xbf16>
    %c5_79 = arith.constant 5 : index
    %c0_80 = arith.constant 0 : index
    %c0_81 = arith.constant 0 : index
    %203 = vector.load %arg2[%c5_79, %c0_80, %c0_81] : memref<12x1x256xf32, #tpu.memory_space<vmem>>, vector<1x1x128xf32>
    %204 = vector.shape_cast %203 : vector<1x1x128xf32> to vector<1x128xf32>
    %205 = arith.truncf %200 : vector<16x128xf32> to vector<16x128xbf16>
    %cst_82 = arith.constant dense<0.000000e+00> : vector<16x128xf32>
    %206 = tpu.matmul %205, %202, %cst_82 {dimension_numbers = #tpu.dot_dimension_numbers<[1], [0], [0], [1], [0, 0, 1, 1], [], []>} : vector<16x128xbf16>, vector<128x128xbf16>, vector<16x128xf32> -> vector<16x128xf32>
    %207 = vector.broadcast %204 : vector<1x128xf32> to vector<16x128xf32>
    %208 = arith.addf %206, %207 : vector<16x128xf32>
    %209 = vector.broadcast %5 : vector<16x1xf32> to vector<16x128xf32>
    %210 = arith.mulf %208, %209 : vector<16x128xf32>
    %c0_83 = arith.constant 0 : index
    %c0_84 = arith.constant 0 : index
    %211 = vector.load %arg3[%c0_83, %c0_84] : memref<16x128xf32, #tpu.memory_space<vmem>>, vector<16x128xf32>
    tpu.vector_store %arg3[%c0_83, %c0_84], %210 {strides = array<i32>} : memref<16x128xf32, #tpu.memory_space<vmem>>, vector<16x128xf32>,
    %cst_85 = arith.constant dense<0.000000e+00> : vector<128xf32>
    %212 = vector.multi_reduction <add>, %210, %cst_85 [0] : vector<16x128xf32> to vector<128xf32>
    %213 = vector.shape_cast %212 : vector<128xf32> to vector<1x128xf32>
    %214 = arith.mulf %210, %210 : vector<16x128xf32>
    %cst_86 = arith.constant dense<0.000000e+00> : vector<128xf32>
    %215 = vector.multi_reduction <add>, %214, %cst_86 [0] : vector<16x128xf32> to vector<128xf32>
    %216 = vector.shape_cast %215 : vector<128xf32> to vector<1x128xf32>
    %cst_87 = arith.constant 1.250000e-01 : f32
    %217 = vector.broadcast %cst_87 : f32 to vector<1x128xf32>
    %218 = arith.mulf %213, %217 : vector<1x128xf32>
    %cst_88 = arith.constant 1.250000e-01 : f32
    %219 = vector.broadcast %cst_88 : f32 to vector<1x128xf32>
    %220 = arith.mulf %216, %219 : vector<1x128xf32>
    %221 = arith.mulf %218, %218 : vector<1x128xf32>
    %222 = arith.subf %220, %221 : vector<1x128xf32>
    %cst_89 = arith.constant 0.000000e+00 : f32
    %223 = vector.broadcast %cst_89 : f32 to vector<1x128xf32>
    %224 = arith.maximumf %222, %223 : vector<1x128xf32>
    %225 = vector.broadcast %218 : vector<1x128xf32> to vector<16x128xf32>
    %226 = arith.subf %210, %225 : vector<16x128xf32>
    %cst_90 = arith.constant 9.99999974E-6 : f32
    %227 = vector.broadcast %cst_90 : f32 to vector<1x128xf32>
    %228 = arith.addf %224, %227 : vector<1x128xf32>
    %229 = math.rsqrt %228 : vector<1x128xf32>
    %230 = vector.broadcast %229 : vector<1x128xf32> to vector<16x128xf32>
    %231 = arith.mulf %226, %230 : vector<16x128xf32>
    %c6 = arith.constant 6 : index
    %c0_91 = arith.constant 0 : index
    %c0_92 = arith.constant 0 : index
    %232 = vector.load %arg1[%c6, %c0_91, %c0_92] : memref<12x256x256xbf16, #tpu.memory_space<vmem>>, vector<1x128x128xbf16>
    %233 = vector.shape_cast %232 : vector<1x128x128xbf16> to vector<128x128xbf16>
    %c6_93 = arith.constant 6 : index
    %c0_94 = arith.constant 0 : index
    %c0_95 = arith.constant 0 : index
    %234 = vector.load %arg2[%c6_93, %c0_94, %c0_95] : memref<12x1x256xf32, #tpu.memory_space<vmem>>, vector<1x1x128xf32>
    %235 = vector.shape_cast %234 : vector<1x1x128xf32> to vector<1x128xf32>
    %236 = arith.truncf %231 : vector<16x128xf32> to vector<16x128xbf16>
    %cst_96 = arith.constant dense<0.000000e+00> : vector<16x128xf32>
    %237 = tpu.matmul %236, %233, %cst_96 {dimension_numbers = #tpu.dot_dimension_numbers<[1], [0], [0], [1], [0, 0, 1, 1], [], []>} : vector<16x128xbf16>, vector<128x128xbf16>, vector<16x128xf32> -> vector<16x128xf32>
    %238 = vector.broadcast %235 : vector<1x128xf32> to vector<16x128xf32>
    %239 = arith.addf %237, %238 : vector<16x128xf32>
    %cst_97 = arith.constant 0.000000e+00 : f32
    %240 = vector.broadcast %cst_97 : f32 to vector<16x128xf32>
    %241 = arith.cmpf oge, %239, %240 : vector<16x128xf32>
    %cst_98 = arith.constant 2.000000e-01 : f32
    %242 = vector.broadcast %cst_98 : f32 to vector<16x128xf32>
    %243 = arith.mulf %242, %239 : vector<16x128xf32>
    %244 = arith.select %241, %239, %243 : vector<16x128xi1>, vector<16x128xf32>
    %245 = vector.broadcast %5 : vector<16x1xf32> to vector<16x128xf32>
    %246 = arith.mulf %244, %245 : vector<16x128xf32>
    %cst_99 = arith.constant dense<0.000000e+00> : vector<128xf32>
    %247 = vector.multi_reduction <add>, %246, %cst_99 [0] : vector<16x128xf32> to vector<128xf32>
    %248 = vector.shape_cast %247 : vector<128xf32> to vector<1x128xf32>
    %249 = arith.mulf %246, %246 : vector<16x128xf32>
    %cst_100 = arith.constant dense<0.000000e+00> : vector<128xf32>
    %250 = vector.multi_reduction <add>, %249, %cst_100 [0] : vector<16x128xf32> to vector<128xf32>
    %251 = vector.shape_cast %250 : vector<128xf32> to vector<1x128xf32>
    %cst_101 = arith.constant 1.250000e-01 : f32
    %252 = vector.broadcast %cst_101 : f32 to vector<1x128xf32>
    %253 = arith.mulf %248, %252 : vector<1x128xf32>
    %cst_102 = arith.constant 1.250000e-01 : f32
    %254 = vector.broadcast %cst_102 : f32 to vector<1x128xf32>
    %255 = arith.mulf %251, %254 : vector<1x128xf32>
    %256 = arith.mulf %253, %253 : vector<1x128xf32>
    %257 = arith.subf %255, %256 : vector<1x128xf32>
    %cst_103 = arith.constant 0.000000e+00 : f32
    %258 = vector.broadcast %cst_103 : f32 to vector<1x128xf32>
    %259 = arith.maximumf %257, %258 : vector<1x128xf32>
    %260 = vector.broadcast %253 : vector<1x128xf32> to vector<16x128xf32>
    %261 = arith.subf %246, %260 : vector<16x128xf32>
    %cst_104 = arith.constant 9.99999974E-6 : f32
    %262 = vector.broadcast %cst_104 : f32 to vector<1x128xf32>
    %263 = arith.addf %259, %262 : vector<1x128xf32>
    %264 = math.rsqrt %263 : vector<1x128xf32>
    %265 = vector.broadcast %264 : vector<1x128xf32> to vector<16x128xf32>
    %266 = arith.mulf %261, %265 : vector<16x128xf32>
    %c7 = arith.constant 7 : index
    %c0_105 = arith.constant 0 : index
    %c0_106 = arith.constant 0 : index
    %267 = vector.load %arg1[%c7, %c0_105, %c0_106] : memref<12x256x256xbf16, #tpu.memory_space<vmem>>, vector<1x128x256xbf16>
    %268 = vector.shape_cast %267 : vector<1x128x256xbf16> to vector<128x256xbf16>
    %c7_107 = arith.constant 7 : index
    %c0_108 = arith.constant 0 : index
    %c0_109 = arith.constant 0 : index
    %269 = vector.load %arg2[%c7_107, %c0_108, %c0_109] : memref<12x1x256xf32, #tpu.memory_space<vmem>>, vector<1x1x256xf32>
    %270 = vector.shape_cast %269 : vector<1x1x256xf32> to vector<1x256xf32>
    %271 = arith.truncf %266 : vector<16x128xf32> to vector<16x128xbf16>
    %cst_110 = arith.constant dense<0.000000e+00> : vector<16x256xf32>
    %272 = tpu.matmul %271, %268, %cst_110 {dimension_numbers = #tpu.dot_dimension_numbers<[1], [0], [0], [1], [0, 0, 1, 1], [], []>} : vector<16x128xbf16>, vector<128x256xbf16>, vector<16x256xf32> -> vector<16x256xf32>
    %273 = vector.broadcast %270 : vector<1x256xf32> to vector<16x256xf32>
    %274 = arith.addf %272, %273 : vector<16x256xf32>
    %cst_111 = arith.constant 0.000000e+00 : f32
    %275 = vector.broadcast %cst_111 : f32 to vector<16x256xf32>
    %276 = arith.cmpf oge, %274, %275 : vector<16x256xf32>
    %cst_112 = arith.constant 2.000000e-01 : f32
    %277 = vector.broadcast %cst_112 : f32 to vector<16x256xf32>
    %278 = arith.mulf %277, %274 : vector<16x256xf32>
    %279 = arith.select %276, %274, %278 : vector<16x256xi1>, vector<16x256xf32>
    %280 = vector.broadcast %5 : vector<16x1xf32> to vector<16x256xf32>
    %281 = arith.mulf %279, %280 : vector<16x256xf32>
    %cst_113 = arith.constant dense<0.000000e+00> : vector<256xf32>
    %282 = vector.multi_reduction <add>, %281, %cst_113 [0] : vector<16x256xf32> to vector<256xf32>
    %283 = vector.shape_cast %282 : vector<256xf32> to vector<1x256xf32>
    %284 = arith.mulf %281, %281 : vector<16x256xf32>
    %cst_114 = arith.constant dense<0.000000e+00> : vector<256xf32>
    %285 = vector.multi_reduction <add>, %284, %cst_114 [0] : vector<16x256xf32> to vector<256xf32>
    %286 = vector.shape_cast %285 : vector<256xf32> to vector<1x256xf32>
    %cst_115 = arith.constant 1.250000e-01 : f32
    %287 = vector.broadcast %cst_115 : f32 to vector<1x256xf32>
    %288 = arith.mulf %283, %287 : vector<1x256xf32>
    %cst_116 = arith.constant 1.250000e-01 : f32
    %289 = vector.broadcast %cst_116 : f32 to vector<1x256xf32>
    %290 = arith.mulf %286, %289 : vector<1x256xf32>
    %291 = arith.mulf %288, %288 : vector<1x256xf32>
    %292 = arith.subf %290, %291 : vector<1x256xf32>
    %cst_117 = arith.constant 0.000000e+00 : f32
    %293 = vector.broadcast %cst_117 : f32 to vector<1x256xf32>
    %294 = arith.maximumf %292, %293 : vector<1x256xf32>
    %295 = vector.broadcast %288 : vector<1x256xf32> to vector<16x256xf32>
    %296 = arith.subf %281, %295 : vector<16x256xf32>
    %cst_118 = arith.constant 9.99999974E-6 : f32
    %297 = vector.broadcast %cst_118 : f32 to vector<1x256xf32>
    %298 = arith.addf %294, %297 : vector<1x256xf32>
    %299 = math.rsqrt %298 : vector<1x256xf32>
    %300 = vector.broadcast %299 : vector<1x256xf32> to vector<16x256xf32>
    %301 = arith.mulf %296, %300 : vector<16x256xf32>
    %c8 = arith.constant 8 : index
    %c0_119 = arith.constant 0 : index
    %c0_120 = arith.constant 0 : index
    %302 = vector.load %arg1[%c8, %c0_119, %c0_120] : memref<12x256x256xbf16, #tpu.memory_space<vmem>>, vector<1x256x256xbf16>
    %303 = vector.shape_cast %302 : vector<1x256x256xbf16> to vector<256x256xbf16>
    %c8_121 = arith.constant 8 : index
    %c0_122 = arith.constant 0 : index
    %c0_123 = arith.constant 0 : index
    %304 = vector.load %arg2[%c8_121, %c0_122, %c0_123] : memref<12x1x256xf32, #tpu.memory_space<vmem>>, vector<1x1x256xf32>
    %305 = vector.shape_cast %304 : vector<1x1x256xf32> to vector<1x256xf32>
    %306 = arith.truncf %301 : vector<16x256xf32> to vector<16x256xbf16>
    %cst_124 = arith.constant dense<0.000000e+00> : vector<16x256xf32>
    %307 = tpu.matmul %306, %303, %cst_124 {dimension_numbers = #tpu.dot_dimension_numbers<[1], [0], [0], [1], [0, 0, 1, 1], [], []>} : vector<16x256xbf16>, vector<256x256xbf16>, vector<16x256xf32> -> vector<16x256xf32>
    %308 = vector.broadcast %305 : vector<1x256xf32> to vector<16x256xf32>
    %309 = arith.addf %307, %308 : vector<16x256xf32>
    %cst_125 = arith.constant 0.000000e+00 : f32
    %310 = vector.broadcast %cst_125 : f32 to vector<16x256xf32>
    %311 = arith.cmpf oge, %309, %310 : vector<16x256xf32>
    %cst_126 = arith.constant 2.000000e-01 : f32
    %312 = vector.broadcast %cst_126 : f32 to vector<16x256xf32>
    %313 = arith.mulf %312, %309 : vector<16x256xf32>
    %314 = arith.select %311, %309, %313 : vector<16x256xi1>, vector<16x256xf32>
    %315 = vector.broadcast %5 : vector<16x1xf32> to vector<16x256xf32>
    %316 = arith.mulf %314, %315 : vector<16x256xf32>
    %cst_127 = arith.constant dense<0.000000e+00> : vector<256xf32>
    %317 = vector.multi_reduction <add>, %316, %cst_127 [0] : vector<16x256xf32> to vector<256xf32>
    %318 = vector.shape_cast %317 : vector<256xf32> to vector<1x256xf32>
    %319 = arith.mulf %316, %316 : vector<16x256xf32>
    %cst_128 = arith.constant dense<0.000000e+00> : vector<256xf32>
    %320 = vector.multi_reduction <add>, %319, %cst_128 [0] : vector<16x256xf32> to vector<256xf32>
    %321 = vector.shape_cast %320 : vector<256xf32> to vector<1x256xf32>
    %cst_129 = arith.constant 1.250000e-01 : f32
    %322 = vector.broadcast %cst_129 : f32 to vector<1x256xf32>
    %323 = arith.mulf %318, %322 : vector<1x256xf32>
    %cst_130 = arith.constant 1.250000e-01 : f32
    %324 = vector.broadcast %cst_130 : f32 to vector<1x256xf32>
    %325 = arith.mulf %321, %324 : vector<1x256xf32>
    %326 = arith.mulf %323, %323 : vector<1x256xf32>
    %327 = arith.subf %325, %326 : vector<1x256xf32>
    %cst_131 = arith.constant 0.000000e+00 : f32
    %328 = vector.broadcast %cst_131 : f32 to vector<1x256xf32>
    %329 = arith.maximumf %327, %328 : vector<1x256xf32>
    %330 = vector.broadcast %323 : vector<1x256xf32> to vector<16x256xf32>
    %331 = arith.subf %316, %330 : vector<16x256xf32>
    %cst_132 = arith.constant 9.99999974E-6 : f32
    %332 = vector.broadcast %cst_132 : f32 to vector<1x256xf32>
    %333 = arith.addf %329, %332 : vector<1x256xf32>
    %334 = math.rsqrt %333 : vector<1x256xf32>
    %335 = vector.broadcast %334 : vector<1x256xf32> to vector<16x256xf32>
    %336 = arith.mulf %331, %335 : vector<16x256xf32>
    %c9 = arith.constant 9 : index
    %c0_133 = arith.constant 0 : index
    %c0_134 = arith.constant 0 : index
    %337 = vector.load %arg1[%c9, %c0_133, %c0_134] : memref<12x256x256xbf16, #tpu.memory_space<vmem>>, vector<1x256x128xbf16>
    %338 = vector.shape_cast %337 : vector<1x256x128xbf16> to vector<256x128xbf16>
    %c9_135 = arith.constant 9 : index
    %c0_136 = arith.constant 0 : index
    %c0_137 = arith.constant 0 : index
    %339 = vector.load %arg2[%c9_135, %c0_136, %c0_137] : memref<12x1x256xf32, #tpu.memory_space<vmem>>, vector<1x1x128xf32>
    %340 = vector.shape_cast %339 : vector<1x1x128xf32> to vector<1x128xf32>
    %341 = arith.truncf %336 : vector<16x256xf32> to vector<16x256xbf16>
    %cst_138 = arith.constant dense<0.000000e+00> : vector<16x128xf32>
    %342 = tpu.matmul %341, %338, %cst_138 {dimension_numbers = #tpu.dot_dimension_numbers<[1], [0], [0], [1], [0, 0, 1, 1], [], []>} : vector<16x256xbf16>, vector<256x128xbf16>, vector<16x128xf32> -> vector<16x128xf32>
    %343 = vector.broadcast %340 : vector<1x128xf32> to vector<16x128xf32>
    %344 = arith.addf %342, %343 : vector<16x128xf32>
    %cst_139 = arith.constant 0.000000e+00 : f32
    %345 = vector.broadcast %cst_139 : f32 to vector<16x128xf32>
    %346 = arith.cmpf oge, %344, %345 : vector<16x128xf32>
    %cst_140 = arith.constant 2.000000e-01 : f32
    %347 = vector.broadcast %cst_140 : f32 to vector<16x128xf32>
    %348 = arith.mulf %347, %344 : vector<16x128xf32>
    %349 = arith.select %346, %344, %348 : vector<16x128xi1>, vector<16x128xf32>
    %350 = vector.broadcast %5 : vector<16x1xf32> to vector<16x128xf32>
    %351 = arith.mulf %349, %350 : vector<16x128xf32>
    %cst_141 = arith.constant dense<0.000000e+00> : vector<128xf32>
    %352 = vector.multi_reduction <add>, %351, %cst_141 [0] : vector<16x128xf32> to vector<128xf32>
    %353 = vector.shape_cast %352 : vector<128xf32> to vector<1x128xf32>
    %354 = arith.mulf %351, %351 : vector<16x128xf32>
    %cst_142 = arith.constant dense<0.000000e+00> : vector<128xf32>
    %355 = vector.multi_reduction <add>, %354, %cst_142 [0] : vector<16x128xf32> to vector<128xf32>
    %356 = vector.shape_cast %355 : vector<128xf32> to vector<1x128xf32>
    %cst_143 = arith.constant 1.250000e-01 : f32
    %357 = vector.broadcast %cst_143 : f32 to vector<1x128xf32>
    %358 = arith.mulf %353, %357 : vector<1x128xf32>
    %cst_144 = arith.constant 1.250000e-01 : f32
    %359 = vector.broadcast %cst_144 : f32 to vector<1x128xf32>
    %360 = arith.mulf %356, %359 : vector<1x128xf32>
    %361 = arith.mulf %358, %358 : vector<1x128xf32>
    %362 = arith.subf %360, %361 : vector<1x128xf32>
    %cst_145 = arith.constant 0.000000e+00 : f32
    %363 = vector.broadcast %cst_145 : f32 to vector<1x128xf32>
    %364 = arith.maximumf %362, %363 : vector<1x128xf32>
    %365 = vector.broadcast %358 : vector<1x128xf32> to vector<16x128xf32>
    %366 = arith.subf %351, %365 : vector<16x128xf32>
    %cst_146 = arith.constant 9.99999974E-6 : f32
    %367 = vector.broadcast %cst_146 : f32 to vector<1x128xf32>
    %368 = arith.addf %364, %367 : vector<1x128xf32>
    %369 = math.rsqrt %368 : vector<1x128xf32>
    %370 = vector.broadcast %369 : vector<1x128xf32> to vector<16x128xf32>
    %371 = arith.mulf %366, %370 : vector<16x128xf32>
    %c10 = arith.constant 10 : index
    %c0_147 = arith.constant 0 : index
    %c0_148 = arith.constant 0 : index
    %372 = vector.load %arg1[%c10, %c0_147, %c0_148] : memref<12x256x256xbf16, #tpu.memory_space<vmem>>, vector<1x128x128xbf16>
    %373 = vector.shape_cast %372 : vector<1x128x128xbf16> to vector<128x128xbf16>
    %c10_149 = arith.constant 10 : index
    %c0_150 = arith.constant 0 : index
    %c0_151 = arith.constant 0 : index
    %374 = vector.load %arg2[%c10_149, %c0_150, %c0_151] : memref<12x1x256xf32, #tpu.memory_space<vmem>>, vector<1x1x128xf32>
    %375 = vector.shape_cast %374 : vector<1x1x128xf32> to vector<1x128xf32>
    %376 = arith.truncf %371 : vector<16x128xf32> to vector<16x128xbf16>
    %cst_152 = arith.constant dense<0.000000e+00> : vector<16x128xf32>
    %377 = tpu.matmul %376, %373, %cst_152 {dimension_numbers = #tpu.dot_dimension_numbers<[1], [0], [0], [1], [0, 0, 1, 1], [], []>} : vector<16x128xbf16>, vector<128x128xbf16>, vector<16x128xf32> -> vector<16x128xf32>
    %378 = vector.broadcast %375 : vector<1x128xf32> to vector<16x128xf32>
    %379 = arith.addf %377, %378 : vector<16x128xf32>
    %cst_153 = arith.constant 0.000000e+00 : f32
    %380 = vector.broadcast %cst_153 : f32 to vector<16x128xf32>
    %381 = arith.cmpf oge, %379, %380 : vector<16x128xf32>
    %cst_154 = arith.constant 2.000000e-01 : f32
    %382 = vector.broadcast %cst_154 : f32 to vector<16x128xf32>
    %383 = arith.mulf %382, %379 : vector<16x128xf32>
    %384 = arith.select %381, %379, %383 : vector<16x128xi1>, vector<16x128xf32>
    %385 = vector.broadcast %5 : vector<16x1xf32> to vector<16x128xf32>
    %386 = arith.mulf %384, %385 : vector<16x128xf32>
    %cst_155 = arith.constant dense<0.000000e+00> : vector<128xf32>
    %387 = vector.multi_reduction <add>, %386, %cst_155 [0] : vector<16x128xf32> to vector<128xf32>
    %388 = vector.shape_cast %387 : vector<128xf32> to vector<1x128xf32>
    %389 = arith.mulf %386, %386 : vector<16x128xf32>
    %cst_156 = arith.constant dense<0.000000e+00> : vector<128xf32>
    %390 = vector.multi_reduction <add>, %389, %cst_156 [0] : vector<16x128xf32> to vector<128xf32>
    %391 = vector.shape_cast %390 : vector<128xf32> to vector<1x128xf32>
    %cst_157 = arith.constant 1.250000e-01 : f32
    %392 = vector.broadcast %cst_157 : f32 to vector<1x128xf32>
    %393 = arith.mulf %388, %392 : vector<1x128xf32>
    %cst_158 = arith.constant 1.250000e-01 : f32
    %394 = vector.broadcast %cst_158 : f32 to vector<1x128xf32>
    %395 = arith.mulf %391, %394 : vector<1x128xf32>
    %396 = arith.mulf %393, %393 : vector<1x128xf32>
    %397 = arith.subf %395, %396 : vector<1x128xf32>
    %cst_159 = arith.constant 0.000000e+00 : f32
    %398 = vector.broadcast %cst_159 : f32 to vector<1x128xf32>
    %399 = arith.maximumf %397, %398 : vector<1x128xf32>
    %400 = vector.broadcast %393 : vector<1x128xf32> to vector<16x128xf32>
    %401 = arith.subf %386, %400 : vector<16x128xf32>
    %cst_160 = arith.constant 9.99999974E-6 : f32
    %402 = vector.broadcast %cst_160 : f32 to vector<1x128xf32>
    %403 = arith.addf %399, %402 : vector<1x128xf32>
    %404 = math.rsqrt %403 : vector<1x128xf32>
    %405 = vector.broadcast %404 : vector<1x128xf32> to vector<16x128xf32>
    %406 = arith.mulf %401, %405 : vector<16x128xf32>
    %c11 = arith.constant 11 : index
    %c0_161 = arith.constant 0 : index
    %c0_162 = arith.constant 0 : index
    %407 = vector.load %arg1[%c11, %c0_161, %c0_162] : memref<12x256x256xbf16, #tpu.memory_space<vmem>>, vector<1x128x128xbf16>
    %408 = vector.shape_cast %407 : vector<1x128x128xbf16> to vector<128x128xbf16>
    %c11_163 = arith.constant 11 : index
    %c0_164 = arith.constant 0 : index
    %c0_165 = arith.constant 0 : index
    %409 = vector.load %arg2[%c11_163, %c0_164, %c0_165] : memref<12x1x256xf32, #tpu.memory_space<vmem>>, vector<1x1x128xf32>
    %410 = vector.shape_cast %409 : vector<1x1x128xf32> to vector<1x128xf32>
    %411 = arith.truncf %406 : vector<16x128xf32> to vector<16x128xbf16>
    %cst_166 = arith.constant dense<0.000000e+00> : vector<16x128xf32>
    %412 = tpu.matmul %411, %408, %cst_166 {dimension_numbers = #tpu.dot_dimension_numbers<[1], [0], [0], [1], [0, 0, 1, 1], [], []>} : vector<16x128xbf16>, vector<128x128xbf16>, vector<16x128xf32> -> vector<16x128xf32>
    %413 = vector.broadcast %410 : vector<1x128xf32> to vector<16x128xf32>
    %414 = arith.addf %412, %413 : vector<16x128xf32>
    %c0_167 = arith.constant 0 : index
    %c0_168 = arith.constant 0 : index
    %415 = vector.load %arg4[%c0_167, %c0_168] : memref<16x128xf32, #tpu.memory_space<vmem>>, vector<16x128xf32>
    tpu.vector_store %arg4[%c0_167, %c0_168], %414 {strides = array<i32>} : memref<16x128xf32, #tpu.memory_space<vmem>>, vector<16x128xf32>,
    return
  }
}

</mosaic_0001>

<bundles_post_ra>
// kernel: swautoencoder_forward.1
= control target key start
LH: loop header
LB: loop body
LE: loop exit
PB: predicated region body
PF: predicated region fallthrough
CT: control target
= control target key end

     0   :  { %v3356_v0 = vmov 0.0   ;;  %vm3357_vm0 = vmmov 0   ;;  %s4040_s1 = inlined_call_operand.vmem [shape: bf16[12,256,256], index: 1, kind: input, shape index: {}]   ;;  %s4041_s0 = inlined_call_operand.vmem [shape: f32[16,128], index: 0, kind: input, shape index: {}]   ;;  %s4042_s2 = inlined_call_operand.vmem [shape: f32[12,1,256], index: 2, kind: input, shape index: {}]   ;;  %s4043_s3 = inlined_call_operand.vmem [shape: f32[16,128], index: 3, kind: output, shape index: {0}]   ;;  %s4044_s4 = inlined_call_operand.vmem [shape: f32[16,128], index: 4, kind: output, shape index: {1}]  }
   0x1   :  { %2977 = vmatprep.subr.bf16.mxu0 %v3356_v0  ;;  %v3100_v1 = vld [vmem:[%s4040_s1] ss:$8 sps:$4 sm:$0xff]   ;;  %2993 = vmatprep.mubr.msk.bf16.mxu0 %vm3357_vm0, %v3356_v0  ;;  %v3101_v2 = vld [vmem:[%s4040_s1 + $0x10] ss:$8 sps:$4 sm:$0xff]  }
   0x2   :  { %2997 = vmatprep.subr.bf16.mxu1 %v3356_v0  ;;  %3013 = vmatprep.mubr.msk.bf16.mxu1 %vm3357_vm0, %v3356_v0  ;;  %v3102_v3 = vld [vmem:[%s4040_s1 + $0x20] ss:$8 sps:$4 sm:$0xff]   ;;  %v3103_v4 = vld [vmem:[%s4040_s1 + $0x30] ss:$8 sps:$4 sm:$0xff]  }
   0x3   :  { %2978 = vmatpush3.bf16.msra.mxu0 %v3100_v1  ;;  %v17_v5 = vld [vmem:[%s4041_s0] sm:$0xff]  ;;  %v18_v6 = vld [vmem:[%s4041_s0 + $0x8] sm:$0xff]  ;;  %v3105_v17 = vld [vmem:[%s4040_s1 + $0x50] ss:$8 sps:$4 sm:$0xff]  }
   0x4   :  { %2979 = vmatprep.subr.bf16.mxu0 %v3356_v0  ;;  %v28_v7 = vadd.f32 %v18_v6, %v17_v5  ;;  %v35_v8 = vmul.f32 %v17_v5, %v17_v5  ;;  %v36_v9 = vmul.f32 %v18_v6, %v18_v6  ;;  %v3104_v12 = vld [vmem:[%s4040_s1 + $0x40] ss:$8 sps:$4 sm:$0xff]   ;;  %v3107_v27 = vld [vmem:[%s4040_s1 + $0x70] ss:$8 sps:$4 sm:$0xff]  }
   0x5   :  { %v3106_v22 = vld [vmem:[%s4040_s1 + $0x60] ss:$8 sps:$4 sm:$0xff]   ;;  %v3109_v40 = vld [vmem:[%s4040_s1 + $0x110] ss:$8 sps:$4 sm:$0xff]  }
   0x6   :  { %v29_v10 = vrot.slane %v28_v7, 4  ;;  %v37_v11 = vadd.f32 %v36_v9, %v35_v8  ;;  %v3108_v39 = vld [vmem:[%s4040_s1 + $0x100] ss:$8 sps:$4 sm:$0xff]   ;;  %v3111_v42 = vld [vmem:[%s4040_s1 + $0x130] ss:$8 sps:$4 sm:$0xff]  }
   0x7   :  { %2980 = vmatpush3.bf16.msra.mxu0 %v3101_v2  ;;  %2998 = vmatpush3.bf16.msra.mxu1 %v3108_v39  ;;  %v3110_v41 = vld [vmem:[%s4040_s1 + $0x120] ss:$8 sps:$4 sm:$0xff]   ;;  %v3113_v44 = vld [vmem:[%s4040_s1 + $0x150] ss:$8 sps:$4 sm:$0xff]   ;;  %v3139_v39 = vld [vmem:[%s4040_s1 + $0x274] ss:$8 sps:$4 sm:$0xff]  }
   0x8   :  { %2981 = vmatprep.subr.bf16.mxu0 %v3356_v0  ;;  %v30_v13 = vadd.f32 %v29_v10, %v28_v7  ;;  %v38_v14 = vrot.slane %v37_v11, 4  ;;  %2999 = vmatprep.subr.bf16.mxu1 %v3356_v0  ;;  %v3112_v43 = vld [vmem:[%s4040_s1 + $0x140] ss:$8 sps:$4 sm:$0xff]   ;;  %v3115_v46 = vld [vmem:[%s4040_s1 + $0x170] ss:$8 sps:$4 sm:$0xff]  }
   0x9   :  { %v3114_v45 = vld [vmem:[%s4040_s1 + $0x160] ss:$8 sps:$4 sm:$0xff]  }
   0xa   :  { %v31_v15 = vrot.slane %v30_v13, 2  ;;  %v39_v16 = vadd.f32 %v38_v14, %v37_v11  ;;  %v2444_v47 = vld [vmem:[%s4042_s2] ss:$0 sm:$0xff] }
   0xb   :  { %2982 = vmatpush3.bf16.msra.mxu0 %v3102_v3  ;;  %3000 = vmatpush3.bf16.msra.mxu1 %v3109_v40  ;;  %v3137_v40 = vld [vmem:[%s4040_s1 + $0x270] ss:$8 sps:$4 sm:$0xff]  }
   0xc   :  { %2983 = vmatprep.subr.bf16.mxu0 %v3356_v0  ;;  %v32_v18 = vadd.f32 %v31_v15, %v30_v13  ;;  %v40_v19 = vrot.slane %v39_v16, 2  ;;  %3001 = vmatprep.subr.bf16.mxu1 %v3356_v0 }
   0xe   :  { %v33_v20 = vrot.slane %v32_v18, 1  ;;  %v41_v21 = vadd.f32 %v40_v19, %v39_v16 }
   0xf   :  { %2984 = vmatpush3.bf16.msra.mxu0 %v3103_v4  ;;  %3002 = vmatpush3.bf16.msra.mxu1 %v3110_v41  ;;  %v3140_v41 = vld [vmem:[%s4040_s1 + $0x300] ss:$8 sps:$4 sm:$0xff]  }
  0x10   :  { %2985 = vmatprep.subr.bf16.mxu0 %v3356_v0  ;;  %v34_v23 = vadd.f32 %v33_v20, %v32_v18  ;;  %v42_v24 = vrot.slane %v41_v21, 1  ;;  %3003 = vmatprep.subr.bf16.mxu1 %v3356_v0 }
  0x12   :  { %v43_v25 = vadd.f32 %v42_v24, %v41_v21  ;;  %v44_v26 = vmul.f32 0.125, %v34_v23  ;;  %v3118_v24 = vld [vmem:[%s4040_s1 + $0x204] ss:$8 sps:$4 sm:$0xff]  }
  0x13   :  { %2986 = vmatpush3.bf16.msra.mxu0 %v3104_v12  ;;  %3004 = vmatpush3.bf16.msra.mxu1 %v3111_v42  ;;  %v3142_v42 = vld [vmem:[%s4040_s1 + $0x304] ss:$8 sps:$4 sm:$0xff]  }
  0x14   :  { %2987 = vmatprep.subr.bf16.mxu0 %v3356_v0  ;;  %v45_v28 = vmul.f32 0.125, %v43_v25  ;;  %v46_v29 = vmul.f32 %v44_v26, %v44_v26  ;;  %v49_v33 = vsub.f32 %v17_v5, %v44_v26  ;;  %v50_v34 = vsub.f32 %v18_v6, %v44_v26  ;;  %3005 = vmatprep.subr.bf16.mxu1 %v3356_v0  ;;  %v3116_v25 = vld [vmem:[%s4040_s1 + $0x200] ss:$8 sps:$4 sm:$0xff]   ;;  %v3121_v26 = vld [vmem:[%s4040_s1 + $0x214] ss:$8 sps:$4 sm:$0xff]  }
  0x16   :  { %v47_v30 = vsub.f32 %v45_v28, %v46_v29  ;;  %v3124_v28 = vld [vmem:[%s4040_s1 + $0x224] ss:$8 sps:$4 sm:$0xff]   ;;  %v3122_v29 = vld [vmem:[%s4040_s1 + $0x220] ss:$8 sps:$4 sm:$0xff]  }
  0x17   :  { %2988 = vmatpush3.bf16.msra.mxu0 %v3105_v17  ;;  %3006 = vmatpush3.bf16.msra.mxu1 %v3112_v43  ;;  %v3145_v43 = vld [vmem:[%s4040_s1 + $0x314] ss:$8 sps:$4 sm:$0xff]  }
  0x18   :  { %2989 = vmatprep.subr.bf16.mxu0 %v3356_v0  ;;  %v48_v31 = vmax.f32 %v47_v30, 0.0  ;;  %3007 = vmatprep.subr.bf16.mxu1 %v3356_v0  ;;  %v3127_v30 = vld [vmem:[%s4040_s1 + $0x234] ss:$8 sps:$4 sm:$0xff]  }
  0x1a   :  { %v51_v32 = vadd.f32 1e-05, %v48_v31  ;;  %v3125_v31 = vld [vmem:[%s4040_s1 + $0x230] ss:$8 sps:$4 sm:$0xff]  }
  0x1b   :  { %2990 = vmatpush3.bf16.msra.mxu0 %v3106_v22  ;;  %3008 = vmatpush3.bf16.msra.mxu1 %v3113_v44  ;;  %v3143_v44 = vld [vmem:[%s4040_s1 + $0x310] ss:$8 sps:$4 sm:$0xff]  }
  0x1c   :  { %2991 = vmatprep.subr.bf16.mxu0 %v3356_v0  ;;  %3324 = vrsqrt.f32 %v51_v32  ;;  %3009 = vmatprep.subr.bf16.mxu1 %v3356_v0  ;;  %v3128_v32 = vld [vmem:[%s4040_s1 + $0x240] ss:$8 sps:$4 sm:$0xff]  }
  0x1f   :  { %2992 = vmatpush3.bf16.msra.mxu0 %v3107_v27  ;;  %3010 = vmatpush3.bf16.msra.mxu1 %v3114_v45  ;;  %v3119_v27 = vld [vmem:[%s4040_s1 + $0x210] ss:$8 sps:$4 sm:$0xff]   ;;  %v3148_v45 = vld [vmem:[%s4040_s1 + $0x324] ss:$8 sps:$4 sm:$0xff]  }
  0x20   :  { %3011 = vmatprep.subr.bf16.mxu1 %v3356_v0  ;;  %464 = vmatprep.subr.bf16.mxu0 %v3118_v24 }
  0x23   :  { %3012 = vmatpush3.bf16.msra.mxu1 %v3115_v46  ;;  %v3146_v46 = vld [vmem:[%s4040_s1 + $0x320] ss:$8 sps:$4 sm:$0xff]  }
  0x24   :  { %785 = vmatprep.subr.bf16.mxu1 %v3142_v42  ;;  %v3173_v42 = vld [vmem:[%s4040_s1 + $0x3b0] ss:$8 sps:$4 sm:$0xff]  }
  0x26   :  { %v3325_v35 = vpop.eup %3324 }
  0x27   :  { %v53_v36 = vmul.f32 %v3325_v35, %v49_v33  ;;  %v54_v37 = vmul.f32 %v3325_v35, %v50_v34  ;;  %v3130_v33 = vld [vmem:[%s4040_s1 + $0x244] ss:$8 sps:$4 sm:$0xff]   ;;  %v3133_v34 = vld [vmem:[%s4040_s1 + $0x254] ss:$8 sps:$4 sm:$0xff]   ;;  %v3358_v35 = vmov 0  }
  0x29   :  { %v72_v38 = vpack.c.bf16 %v54_v37, %v53_v36  ;;  %v3131_v36 = vld [vmem:[%s4040_s1 + $0x250] ss:$8 sps:$4 sm:$0xff]   ;;  %v3136_v37 = vld [vmem:[%s4040_s1 + $0x264] ss:$8 sps:$4 sm:$0xff]  }
  0x2b   :  { %2994 = vmatmul.mubr.bf16.vlgmr.msra.gmra.mrb[0].mxu0 %v72_v38  ;;  %v3134_v38 = vld [vmem:[%s4040_s1 + $0x260] ss:$8 sps:$4 sm:$0xff]  }
  0x2c   :  { %465 = vmatpush1.bf16.msra.mxu0 %v3116_v25  ;;  %496 = vmatprep.mubr.bf16.mxu0 %v3358_v35 }
  0x2d   :  { %466 = vmatprep.subr.bf16.mxu0 %v3121_v26  ;;  %v3154_v26 = vld [vmem:[%s4040_s1 + $0x344] ss:$8 sps:$4 sm:$0xff]  }
  0x30   :  { %467 = vmatpush1.bf16.msra.mxu0 %v3119_v27  ;;  %v3152_v27 = vld [vmem:[%s4040_s1 + $0x340] ss:$8 sps:$4 sm:$0xff]  }
  0x31   :  { %468 = vmatprep.subr.bf16.mxu0 %v3124_v28  ;;  %v3157_v28 = vld [vmem:[%s4040_s1 + $0x354] ss:$8 sps:$4 sm:$0xff]  }
  0x34   :  { %469 = vmatpush1.bf16.msra.mxu0 %v3122_v29  ;;  %v3155_v29 = vld [vmem:[%s4040_s1 + $0x350] ss:$8 sps:$4 sm:$0xff]  }
  0x35   :  { %470 = vmatprep.subr.bf16.mxu0 %v3127_v30  ;;  %v3160_v30 = vld [vmem:[%s4040_s1 + $0x364] ss:$8 sps:$4 sm:$0xff]  }
  0x38   :  { %471 = vmatpush1.bf16.msra.mxu0 %v3125_v31  ;;  %v3158_v31 = vld [vmem:[%s4040_s1 + $0x360] ss:$8 sps:$4 sm:$0xff]  }
  0x39   :  { %472 = vmatprep.subr.bf16.mxu0 %v3130_v33  ;;  %v3161_v33 = vld [vmem:[%s4040_s1 + $0x370] ss:$8 sps:$4 sm:$0xff]  }
  0x3c   :  { %473 = vmatpush1.bf16.msra.mxu0 %v3128_v32  ;;  %v3163_v32 = vld [vmem:[%s4040_s1 + $0x374] ss:$8 sps:$4 sm:$0xff]  }
  0x3d   :  { %474 = vmatprep.subr.bf16.mxu0 %v3133_v34  ;;  %v3166_v34 = vld [vmem:[%s4040_s1 + $0x384] ss:$8 sps:$4 sm:$0xff]  }
  0x40   :  { %475 = vmatpush1.bf16.msra.mxu0 %v3131_v36  ;;  %v3164_v36 = vld [vmem:[%s4040_s1 + $0x380] ss:$8 sps:$4 sm:$0xff]  }
  0x41   :  { %476 = vmatprep.subr.bf16.mxu0 %v3136_v37  ;;  %v3169_v37 = vld [vmem:[%s4040_s1 + $0x394] ss:$8 sps:$4 sm:$0xff]  }
  0x44   :  { %477 = vmatpush1.bf16.msra.mxu0 %v3134_v38  ;;  %v3167_v38 = vld [vmem:[%s4040_s1 + $0x390] ss:$8 sps:$4 sm:$0xff]  }
  0x45   :  { %478 = vmatprep.subr.bf16.mxu0 %v3139_v39  ;;  %v3172_v39 = vld [vmem:[%s4040_s1 + $0x3a4] ss:$8 sps:$4 sm:$0xff]  }
  0x48   :  { %479 = vmatpush1.bf16.msra.mxu0 %v3137_v40  ;;  %v3170_v40 = vld [vmem:[%s4040_s1 + $0x3a0] ss:$8 sps:$4 sm:$0xff]  }
  0xfe   :  { %v161_v48 = vpop.f32.mrb[0].mxu0 }
  0xff   :  { %v162_v49 = vadd.f32 %v2444_v47, %v161_v48  ;;  %v2995_v50 = vpop.f32.mrb[1].mxu0  ;;  %v3149_v48 = vld [vmem:[%s4040_s1 + $0x330] ss:$8 sps:$4 sm:$0xff]  }
 0x100   :  { %v164_v51 = vpop.f32.mrb[2].mxu0 }
 0x101   :  { %v170_v52 = vmul.f32 0.2, %v162_v49  ;;  %v165_v53 = vadd.f32 %v2444_v47, %v164_v51  ;;  %v2996_v54 = vpop.f32.mrb[3].mxu0  ;;  %vm168_vm1 = vcmp.ge.f32.partialorder %v162_v49, 0.0  ;;  %v3151_v47 = vld [vmem:[%s4040_s1 + $0x334] ss:$8 sps:$4 sm:$0xff]  }
 0x103   :  { %vm169_vm2 = vcmp.ge.f32.partialorder %v165_v53, 0.0  ;;  %v171_v55 = vmul.f32 0.2, %v165_v53  ;;  %v172_v56 = vsel %vm168_vm1, %v162_v49, %v170_v52  ;;  %v2470_v49 = vld [vmem:[%s4042_s2 + $0x2] ss:$0 sm:$0xff] }
 0x104   :  { %v183_v59 = vmul.f32 %v172_v56, %v172_v56 }
 0x105   :  { %v173_v57 = vsel %vm169_vm2, %v165_v53, %v171_v55 }
 0x106   :  { %v175_v58 = vmul.f32 0.0, %v173_v57 }
 0x108   :  { %v176_v60 = vadd.f32 %v175_v58, %v172_v56  ;;  %v184_v61 = vmul.f32 %v175_v58, %v175_v58 }
 0x10a   :  { %v177_v62 = vrot.slane %v176_v60, 4  ;;  %v185_v63 = vadd.f32 %v184_v61, %v183_v59 }
 0x10c   :  { %v178_v1 = vadd.f32 %v177_v62, %v176_v60  ;;  %v186_v2 = vrot.slane %v185_v63, 4 }
 0x10e   :  { %v179_v3 = vrot.slane %v178_v1, 2  ;;  %v187_v4 = vadd.f32 %v186_v2, %v185_v63 }
 0x110   :  { %v180_v5 = vadd.f32 %v179_v3, %v178_v1  ;;  %v188_v6 = vrot.slane %v187_v4, 2 }
 0x112   :  { %v189_v7 = vadd.f32 %v188_v6, %v187_v4  ;;  %v181_v8 = vrot.slane %v180_v5, 1 }
 0x114   :  { %v190_v9 = vrot.slane %v189_v7, 1  ;;  %v182_v10 = vadd.f32 %v181_v8, %v180_v5 }
 0x116   :  { %v191_v11 = vadd.f32 %v190_v9, %v189_v7  ;;  %v192_v12 = vmul.f32 0.125, %v182_v10 }
 0x118   :  { %v193_v13 = vmul.f32 0.125, %v191_v11  ;;  %v194_v14 = vmul.f32 %v192_v12, %v192_v12  ;;  %v197_v15 = vsub.f32 %v172_v56, %v192_v12  ;;  %v198_v16 = vsub.f32 %v175_v58, %v192_v12 }
 0x11a   :  { %v195_v17 = vsub.f32 %v193_v13, %v194_v14 }
 0x11c   :  { %v196_v18 = vmax.f32 %v195_v17, 0.0 }
 0x11e   :  { %v199_v19 = vadd.f32 1e-05, %v196_v18 }
 0x120   :  { %3326 = vrsqrt.f32 %v199_v19 }
 0x12a   :  { %v3327_v20 = vpop.eup %3326 }
 0x12b   :  { %v201_v21 = vmul.f32 %v3327_v20, %v197_v15  ;;  %v202_v22 = vmul.f32 %v3327_v20, %v198_v16 }
 0x12d   :  { %v222_v23 = vpack.c.bf16 %v202_v22, %v201_v21 }
 0x12f   :  { %3014 = vmatmul.mubr.bf16.vlgmr.msra.gmra.mrb[0].mxu1 %v222_v23 }
 0x130   :  { %786 = vmatpush1.bf16.msra.mxu1 %v3140_v41  ;;  %v3175_v41 = vld [vmem:[%s4040_s1 + $0x3b4] ss:$8 sps:$4 sm:$0xff]  }
 0x131   :  { %787 = vmatprep.subr.bf16.mxu1 %v3145_v43  ;;  %v3178_v43 = vld [vmem:[%s4040_s1 + $0x3c4] ss:$8 sps:$4 sm:$0xff]  }
 0x134   :  { %788 = vmatpush1.bf16.msra.mxu1 %v3143_v44  ;;  %v3176_v44 = vld [vmem:[%s4040_s1 + $0x3c0] ss:$8 sps:$4 sm:$0xff]  }
 0x135   :  { %789 = vmatprep.subr.bf16.mxu1 %v3148_v45  ;;  %v3181_v45 = vld [vmem:[%s4040_s1 + $0x3d4] ss:$8 sps:$4 sm:$0xff]  }
 0x138   :  { %790 = vmatpush1.bf16.msra.mxu1 %v3146_v46  ;;  %v3179_v46 = vld [vmem:[%s4040_s1 + $0x3d0] ss:$8 sps:$4 sm:$0xff]  }
 0x139   :  { %791 = vmatprep.subr.bf16.mxu1 %v3151_v47  ;;  %v3184_v47 = vld [vmem:[%s4040_s1 + $0x3e4] ss:$8 sps:$4 sm:$0xff]  }
 0x13c   :  { %792 = vmatpush1.bf16.msra.mxu1 %v3149_v48  ;;  %v3182_v48 = vld [vmem:[%s4040_s1 + $0x3e0] ss:$8 sps:$4 sm:$0xff]  }
 0x13d   :  { %793 = vmatprep.subr.bf16.mxu1 %v3154_v26 }
 0x140   :  { %794 = vmatpush1.bf16.msra.mxu1 %v3152_v27 }
 0x141   :  { %795 = vmatprep.subr.bf16.mxu1 %v3157_v28 }
 0x144   :  { %796 = vmatpush1.bf16.msra.mxu1 %v3155_v29 }
 0x145   :  { %797 = vmatprep.subr.bf16.mxu1 %v3160_v30 }
 0x148   :  { %798 = vmatpush1.bf16.msra.mxu1 %v3158_v31 }
 0x149   :  { %799 = vmatprep.subr.bf16.mxu1 %v3163_v32 }
 0x14c   :  { %800 = vmatpush1.bf16.msra.mxu1 %v3161_v33 }
 0x14d   :  { %801 = vmatprep.subr.bf16.mxu1 %v3166_v34 }
 0x150   :  { %802 = vmatpush1.bf16.msra.mxu1 %v3164_v36 }
 0x151   :  { %803 = vmatprep.subr.bf16.mxu1 %v3169_v37 }
 0x154   :  { %804 = vmatpush1.bf16.msra.mxu1 %v3167_v38 }
 0x155   :  { %805 = vmatprep.subr.bf16.mxu1 %v3172_v39 }
 0x158   :  { %806 = vmatpush1.bf16.msra.mxu1 %v3170_v40 }
 0x159   :  { %807 = vmatprep.subr.bf16.mxu1 %v3175_v41 }
 0x15c   :  { %808 = vmatpush1.bf16.msra.mxu1 %v3173_v42 }
 0x15d   :  { %809 = vmatprep.subr.bf16.mxu1 %v3178_v43 }
 0x160   :  { %810 = vmatpush1.bf16.msra.mxu1 %v3176_v44 }
 0x161   :  { %811 = vmatprep.subr.bf16.mxu1 %v3181_v45 }
 0x164   :  { %812 = vmatpush1.bf16.msra.mxu1 %v3179_v46 }
 0x165   :  { %813 = vmatprep.subr.bf16.mxu1 %v3184_v47 }
 0x168   :  { %814 = vmatpush1.bf16.msra.mxu1 %v3182_v48 }
 0x202   :  { %v311_v50 = vpop.f32.mrb[0].mxu1 }
 0x203   :  { %v312_v51 = vadd.f32 %v2470_v49, %v311_v50  ;;  %v3015_v52 = vpop.f32.mrb[1].mxu1  ;;  %v3185_v50 = vld [vmem:[%s4040_s1 + $0x3f0] ss:$8 sps:$4 sm:$0xff]  }
 0x204   :  { %v314_v53 = vpop.f32.mrb[2].mxu1 }
 0x205   :  { %v320_v54 = vmul.f32 0.2, %v312_v51  ;;  %v315_v55 = vadd.f32 %v2470_v49, %v314_v53  ;;  %v3016_v56 = vpop.f32.mrb[3].mxu1  ;;  %vm318_vm3 = vcmp.ge.f32.partialorder %v312_v51, 0.0  ;;  %v3187_v49 = vld [vmem:[%s4040_s1 + $0x3f4] ss:$8 sps:$4 sm:$0xff]  }
 0x206   :  { %815 = vmatprep.subr.bf16.mxu1 %v3187_v49 }
 0x207   :  { %vm319_vm4 = vcmp.ge.f32.partialorder %v315_v55, 0.0  ;;  %v321_v57 = vmul.f32 0.2, %v315_v55  ;;  %v322_v58 = vsel %vm318_vm3, %v312_v51, %v320_v54  ;;  %816 = vmatpush1.bf16.msra.mxu1 %v3185_v50  ;;  %v374_v51 = vlaneseq  ;;  %v2495_v54 = vld [vmem:[%s4042_s2 + $0x4] sm:$0x3] }
 0x208   :  { %v333_v61 = vmul.f32 %v322_v58, %v322_v58  ;;  %3037 = vmatprep.subr.bf16.mxu1 %v3356_v0 }
 0x209   :  { %v323_v59 = vsel %vm319_vm4, %v315_v55, %v321_v57  ;;  %v375_v52 = vshrl.u32 %v374_v51, 7 }
 0x20a   :  { %v325_v60 = vmul.f32 0.0, %v323_v59 }
 0x20b   :  { %v3610_v53 = vsub.s32 0, %v375_v52  ;;  %v3615_v55 = vsub.s32 1, %v375_v52 }
 0x20c   :  { %v326_v62 = vadd.f32 %v325_v60, %v322_v58  ;;  %v334_v63 = vmul.f32 %v325_v60, %v325_v60 }
 0x20d   :  { %v377_v56 = vrot.slane %v2495_v54, %v3610_v53  ;;  %v381_v57 = vrot.slane %v2495_v54, %v3615_v55 }
 0x20e   :  { %v327_v1 = vrot.slane %v326_v62, 4  ;;  %v335_v2 = vadd.f32 %v334_v63, %v333_v61 }
 0x210   :  { %v328_v3 = vadd.f32 %v327_v1, %v326_v62  ;;  %v336_v4 = vrot.slane %v335_v2, 4 }
 0x212   :  { %v329_v5 = vrot.slane %v328_v3, 2  ;;  %v337_v6 = vadd.f32 %v336_v4, %v335_v2 }
 0x214   :  { %v330_v7 = vadd.f32 %v329_v5, %v328_v3  ;;  %v338_v8 = vrot.slane %v337_v6, 2 }
 0x216   :  { %v331_v9 = vrot.slane %v330_v7, 1  ;;  %v339_v10 = vadd.f32 %v338_v8, %v337_v6 }
 0x218   :  { %v332_v11 = vadd.f32 %v331_v9, %v330_v7  ;;  %v340_v12 = vrot.slane %v339_v10, 1 }
 0x21a   :  { %v341_v13 = vadd.f32 %v340_v12, %v339_v10  ;;  %v342_v14 = vmul.f32 0.125, %v332_v11 }
 0x21c   :  { %v343_v15 = vmul.f32 0.125, %v341_v13  ;;  %v344_v16 = vmul.f32 %v342_v14, %v342_v14  ;;  %v348_v17 = vsub.f32 %v325_v60, %v342_v14  ;;  %v347_v18 = vsub.f32 %v322_v58, %v342_v14 }
 0x21e   :  { %v345_v19 = vsub.f32 %v343_v15, %v344_v16 }
 0x220   :  { %v346_v20 = vmax.f32 %v345_v19, 0.0 }
 0x222   :  { %v349_v21 = vadd.f32 1e-05, %v346_v20 }
 0x224   :  { %3328 = vrsqrt.f32 %v349_v21 }
 0x22e   :  { %v3329_v22 = vpop.eup %3328 }
 0x22f   :  { %v351_v23 = vmul.f32 %v3329_v22, %v347_v18  ;;  %v352_v24 = vmul.f32 %v3329_v22, %v348_v17 }
 0x231   :  { %v372_v25 = vpack.c.bf16 %v352_v24, %v351_v23 }
 0x233   :  { %497 = vmatmul.mubr.bf16.vlgmr.msra.gmra.mrb[4].mxu0 %v372_v25 }
 0x306   :  { %v498_v58 = vpop.f32.mrb[4].mxu0 }
 0x307   :  { %v499_v59 = vadd.f32 %v498_v58, %v377_v56  ;;  %v500_v60 = vpop.f32.mrb[5].mxu0 }
 0x308   :  { %v501_v61 = vadd.f32 %v500_v60, %v381_v57  ;;  %v502_v62 = vpop.f32.mrb[6].mxu0 }
 0x309   :  { %v511_v63 = vmul.f32 0.2, %v499_v59  ;;  %v503_v1 = vadd.f32 %v502_v62, %v377_v56  ;;  %v504_v2 = vpop.f32.mrb[7].mxu0  ;;  %vm507_vm5 = vcmp.ge.f32.partialorder %v499_v59, 0.0 }
 0x30a   :  { %v512_v3 = vmul.f32 0.2, %v501_v61  ;;  %v505_v4 = vadd.f32 %v504_v2, %v381_v57  ;;  %vm508_vm6 = vcmp.ge.f32.partialorder %v501_v61, 0.0 }
 0x30b   :  { %vm509_vm7 = vcmp.ge.f32.partialorder %v503_v1, 0.0  ;;  %v513_v5 = vmul.f32 0.2, %v503_v1  ;;  %v515_v7 = vsel %vm507_vm5, %v499_v59, %v511_v63 }
 0x30c   :  { %vm510_vm8 = vcmp.ge.f32.partialorder %v505_v4, 0.0  ;;  %v514_v6 = vmul.f32 0.2, %v505_v4  ;;  %v516_v9 = vsel %vm508_vm6, %v501_v61, %v512_v3  ;;  %v537_v13 = vmul.f32 %v515_v7, %v515_v7 }
 0x30d   :  { %v517_v8 = vsel %vm509_vm7, %v503_v1, %v513_v5  ;;  %v538_v16 = vmul.f32 %v516_v9, %v516_v9 }
 0x30e   :  { %v521_v10 = vmul.f32 0.0, %v517_v8  ;;  %v518_v11 = vsel %vm510_vm8, %v505_v4, %v514_v6 }
 0x30f   :  { %v522_v12 = vmul.f32 0.0, %v518_v11  ;;  %v3190_v11 = vld [vmem:[%s4040_s1 + $0x490] ss:$8 sps:$4 sm:$0xff]  }
 0x310   :  { %v523_v14 = vadd.f32 %v521_v10, %v515_v7  ;;  %v539_v15 = vmul.f32 %v521_v10, %v521_v10 }
 0x311   :  { %v530_v17 = vadd.f32 %v522_v12, %v516_v9  ;;  %v540_v18 = vmul.f32 %v522_v12, %v522_v12 }
 0x312   :  { %v524_v19 = vrot.slane %v523_v14, 4  ;;  %v541_v20 = vadd.f32 %v539_v15, %v537_v13  ;;  %v3192_v13 = vld [vmem:[%s4040_s1 + $0x4a0] ss:$8 sps:$4 sm:$0xff]   ;;  %v3194_v15 = vld [vmem:[%s4040_s1 + $0x4b0] ss:$8 sps:$4 sm:$0xff]  }
 0x313   :  { %v531_v21 = vrot.slane %v530_v17, 4  ;;  %v548_v22 = vadd.f32 %v540_v18, %v538_v16  ;;  %v3195_v16 = vld [vmem:[%s4040_s1 + $0x430] ss:$8 sps:$4 sm:$0xff]   ;;  %v3197_v18 = vld [vmem:[%s4040_s1 + $0x440] ss:$8 sps:$4 sm:$0xff]  }
 0x314   :  { %v525_v23 = vadd.f32 %v524_v19, %v523_v14  ;;  %v542_v24 = vrot.slane %v541_v20, 4  ;;  %v3193_v14 = vld [vmem:[%s4040_s1 + $0x420] ss:$8 sps:$4 sm:$0xff]   ;;  %v3198_v19 = vld [vmem:[%s4040_s1 + $0x4d0] ss:$8 sps:$4 sm:$0xff]  }
 0x315   :  { %v532_v25 = vadd.f32 %v531_v21, %v530_v17  ;;  %v549_v26 = vrot.slane %v548_v22, 4  ;;  %v3196_v17 = vld [vmem:[%s4040_s1 + $0x4c0] ss:$8 sps:$4 sm:$0xff]  }
 0x316   :  { %v526_v27 = vrot.slane %v525_v23, 2  ;;  %v543_v28 = vadd.f32 %v542_v24, %v541_v20  ;;  %v3199_v20 = vld [vmem:[%s4040_s1 + $0x450] ss:$8 sps:$4 sm:$0xff]   ;;  %v3200_v21 = vld [vmem:[%s4040_s1 + $0x4e0] ss:$8 sps:$4 sm:$0xff]  }
 0x317   :  { %v533_v29 = vrot.slane %v532_v25, 2  ;;  %v550_v30 = vadd.f32 %v549_v26, %v548_v22  ;;  %v3201_v22 = vld [vmem:[%s4040_s1 + $0x460] ss:$8 sps:$4 sm:$0xff]   ;;  %v3203_v24 = vld [vmem:[%s4040_s1 + $0x470] ss:$8 sps:$4 sm:$0xff]  }
 0x318   :  { %v527_v31 = vadd.f32 %v526_v27, %v525_v23  ;;  %v544_v32 = vrot.slane %v543_v28, 2  ;;  %v3202_v23 = vld [vmem:[%s4040_s1 + $0x4f0] ss:$8 sps:$4 sm:$0xff]  }
 0x319   :  { %v534_v33 = vadd.f32 %v533_v29, %v532_v25  ;;  %v551_v34 = vrot.slane %v550_v30, 2  ;;  %v2544_v25 = vld [vmem:[%s4042_s2 + $0x6] sm:$0x3] }
 0x31a   :  { %v528_v36 = vrot.slane %v527_v31, 1  ;;  %v545_v37 = vadd.f32 %v544_v32, %v543_v28  ;;  %v618_v26 = vrot.slane %v2544_v25, %v3610_v53  ;;  %v622_v27 = vrot.slane %v2544_v25, %v3615_v55 }
 0x31b   :  { %v552_v38 = vadd.f32 %v551_v34, %v550_v30  ;;  %v535_v39 = vrot.slane %v534_v33, 1 }
 0x31c   :  { %v529_v40 = vadd.f32 %v528_v36, %v527_v31  ;;  %v546_v41 = vrot.slane %v545_v37, 1 }
 0x31d   :  { %v553_v42 = vrot.slane %v552_v38, 1  ;;  %v536_v43 = vadd.f32 %v535_v39, %v534_v33 }
 0x31e   :  { %v547_v44 = vadd.f32 %v546_v41, %v545_v37  ;;  %v555_v45 = vmul.f32 0.125, %v529_v40 }
 0x31f   :  { %v554_v46 = vadd.f32 %v553_v42, %v552_v38  ;;  %v556_v47 = vmul.f32 0.125, %v536_v43 }
 0x320   :  { %v557_v48 = vmul.f32 0.125, %v547_v44  ;;  %v559_v49 = vmul.f32 %v555_v45, %v555_v45  ;;  %v567_v50 = vsub.f32 %v521_v10, %v555_v45  ;;  %v565_v51 = vsub.f32 %v515_v7, %v555_v45  ;;  %v3189_v10 = vld [vmem:[%s4040_s1 + $0x400] ss:$8 sps:$4 sm:$0xff]  }
 0x321   :  { %v558_v52 = vmul.f32 0.125, %v554_v46  ;;  %v560_v54 = vmul.f32 %v556_v47, %v556_v47  ;;  %v566_v56 = vsub.f32 %v516_v9, %v556_v47  ;;  %v568_v57 = vsub.f32 %v522_v12, %v556_v47  ;;  %v3188_v9 = vld [vmem:[%s4040_s1 + $0x480] ss:$8 sps:$4 sm:$0xff]   ;;  %v3191_v12 = vld [vmem:[%s4040_s1 + $0x410] ss:$8 sps:$4 sm:$0xff]  }
 0x322   :  { %v561_v58 = vsub.f32 %v557_v48, %v559_v49  ;;  %2897 = vmatprep.subr.bf16.mxu0 %v3188_v9 }
 0x323   :  { %v562_v59 = vsub.f32 %v558_v52, %v560_v54  ;;  %2898 = vmatpush3.bf16.msra.mxu0 %v3189_v10 }
 0x324   :  { %v563_v60 = vmax.f32 %v561_v58, 0.0  ;;  %2899 = vmatprep.subr.bf16.mxu0 %v3190_v11 }
 0x325   :  { %v564_v61 = vmax.f32 %v562_v59, 0.0 }
 0x326   :  { %v569_v62 = vadd.f32 1e-05, %v563_v60 }
 0x327   :  { %v570_v63 = vadd.f32 1e-05, %v564_v61  ;;  %2900 = vmatpush3.bf16.msra.mxu0 %v3191_v12 }
 0x328   :  { %3330 = vrsqrt.f32 %v569_v62  ;;  %2901 = vmatprep.subr.bf16.mxu0 %v3192_v13 }
 0x329   :  { %3332 = vrsqrt.f32 %v570_v63 }
 0x32b   :  { %2902 = vmatpush3.bf16.msra.mxu0 %v3193_v14 }
 0x32c   :  { %2903 = vmatprep.subr.bf16.mxu0 %v3194_v15 }
 0x32f   :  { %2904 = vmatpush3.bf16.msra.mxu0 %v3195_v16 }
 0x330   :  { %2905 = vmatprep.subr.bf16.mxu0 %v3196_v17 }
 0x332   :  { %v3331_v1 = vpop.eup %3330 }
 0x333   :  { %v3333_v2 = vpop.eup %3332  ;;  %v573_v3 = vmul.f32 %v3331_v1, %v565_v51  ;;  %v575_v4 = vmul.f32 %v3331_v1, %v567_v50  ;;  %2906 = vmatpush3.bf16.msra.mxu0 %v3197_v18 }
 0x334   :  { %v574_v5 = vmul.f32 %v3333_v2, %v566_v56  ;;  %v576_v6 = vmul.f32 %v3333_v2, %v568_v57  ;;  %2907 = vmatprep.subr.bf16.mxu0 %v3198_v19 }
 0x335   :  { %v612_v8 = vpack.c.bf16 %v575_v4, %v573_v3 }
 0x336   :  { %v613_v7 = vpack.c.bf16 %v576_v6, %v574_v5 }
 0x337   :  { %2908 = vmatpush3.bf16.msra.mxu0 %v3199_v20 }
 0x338   :  { %817 = vmatprep.mubr.bf16.mxu1 %v613_v7  ;;  %2909 = vmatprep.subr.bf16.mxu0 %v3200_v21 }
 0x339   :  { %818 = vmatmul.mubr.bf16.vlgmr.msra.gmra.mrb[4].mxu1 %v612_v8 }
 0x33a   :  { %3053 = vmatprep.mubr.msk.bf16.mxu1 %vm3357_vm0, %v3356_v0 }
 0x33b   :  { %2910 = vmatpush3.bf16.msra.mxu0 %v3201_v22 }
 0x33c   :  { %2911 = vmatprep.subr.bf16.mxu0 %v3202_v23 }
 0x33f   :  { %2912 = vmatpush3.bf16.msra.mxu0 %v3203_v24 }
 0x340   :  { %3017 = vmatprep.subr.bf16.mxu0 %v3356_v0 }
 0x40c   :  { %v819_v28 = vpop.f32.mrb[4].mxu1 }
 0x40d   :  { %v820_v29 = vadd.f32 %v819_v28, %v618_v26  ;;  %v821_v30 = vpop.f32.mrb[5].mxu1 }
 0x40e   :  { %v822_v31 = vadd.f32 %v821_v30, %v622_v27  ;;  %v823_v32 = vpop.f32.mrb[6].mxu1 }
 0x40f   :  { %v832_v33 = vmul.f32 0.2, %v820_v29  ;;  %v824_v34 = vadd.f32 %v823_v32, %v618_v26  ;;  %v825_v36 = vpop.f32.mrb[7].mxu1  ;;  %vm828_vm9 = vcmp.ge.f32.partialorder %v820_v29, 0.0 }
 0x410   :  { %v833_v37 = vmul.f32 0.2, %v822_v31  ;;  %v826_v38 = vadd.f32 %v825_v36, %v622_v27  ;;  %vm829_vm10 = vcmp.ge.f32.partialorder %v822_v31, 0.0 }
 0x411   :  { %vm830_vm11 = vcmp.ge.f32.partialorder %v824_v34, 0.0  ;;  %v834_v39 = vmul.f32 0.2, %v824_v34  ;;  %v836_v41 = vsel %vm828_vm9, %v820_v29, %v832_v33 }
 0x412   :  { %vm831_vm12 = vcmp.ge.f32.partialorder %v826_v38, 0.0  ;;  %v835_v40 = vmul.f32 0.2, %v826_v38  ;;  %v837_v43 = vsel %vm829_vm10, %v822_v31, %v833_v37  ;;  %v858_v47 = vmul.f32 %v836_v41, %v836_v41 }
 0x413   :  { %v838_v42 = vsel %vm830_vm11, %v824_v34, %v834_v39  ;;  %v859_v50 = vmul.f32 %v837_v43, %v837_v43 }
 0x414   :  { %v842_v44 = vmul.f32 0.0, %v838_v42  ;;  %v839_v45 = vsel %vm831_vm12, %v826_v38, %v835_v40 }
 0x415   :  { %v843_v46 = vmul.f32 0.0, %v839_v45  ;;  %v3206_v45 = vld [vmem:[%s4040_s1 + $0x520] ss:$8 sps:$4 sm:$0xff]  }
 0x416   :  { %v844_v48 = vadd.f32 %v842_v44, %v836_v41  ;;  %v860_v49 = vmul.f32 %v842_v44, %v842_v44 }
 0x417   :  { %v851_v51 = vadd.f32 %v843_v46, %v837_v43  ;;  %v861_v52 = vmul.f32 %v843_v46, %v843_v46 }
 0x418   :  { %v845_v54 = vrot.slane %v844_v48, 4  ;;  %v862_v56 = vadd.f32 %v860_v49, %v858_v47  ;;  %v3208_v47 = vld [vmem:[%s4040_s1 + $0x540] ss:$8 sps:$4 sm:$0xff]  }
 0x419   :  { %v852_v57 = vrot.slane %v851_v51, 4  ;;  %v869_v58 = vadd.f32 %v861_v52, %v859_v50  ;;  %v3210_v49 = vld [vmem:[%s4040_s1 + $0x560] ss:$8 sps:$4 sm:$0xff]   ;;  %v3211_v50 = vld [vmem:[%s4040_s1 + $0x570] ss:$8 sps:$4 sm:$0xff]  }
 0x41a   :  { %v846_v59 = vadd.f32 %v845_v54, %v844_v48  ;;  %v863_v60 = vrot.slane %v862_v56, 4  ;;  %v3209_v48 = vld [vmem:[%s4040_s1 + $0x550] ss:$8 sps:$4 sm:$0xff]   ;;  %v2610_v52 = vld [vmem:[%s4042_s2 + $0x8] ss:$0 sm:$0xff] }
 0x41b   :  { %v853_v61 = vadd.f32 %v852_v57, %v851_v51  ;;  %v870_v62 = vrot.slane %v869_v58, 4 }
 0x41c   :  { %v847_v63 = vrot.slane %v846_v59, 2  ;;  %v864_v1 = vadd.f32 %v863_v60, %v862_v56 }
 0x41d   :  { %v854_v2 = vrot.slane %v853_v61, 2  ;;  %v871_v3 = vadd.f32 %v870_v62, %v869_v58 }
 0x41e   :  { %v848_v4 = vadd.f32 %v847_v63, %v846_v59  ;;  %v865_v5 = vrot.slane %v864_v1, 2 }
 0x41f   :  { %v855_v6 = vadd.f32 %v854_v2, %v853_v61  ;;  %v872_v8 = vrot.slane %v871_v3, 2 }
 0x420   :  { %v849_v7 = vrot.slane %v848_v4, 1  ;;  %v866_v9 = vadd.f32 %v865_v5, %v864_v1 }
 0x421   :  { %v873_v10 = vadd.f32 %v872_v8, %v871_v3  ;;  %v856_v11 = vrot.slane %v855_v6, 1 }
 0x422   :  { %v850_v12 = vadd.f32 %v849_v7, %v848_v4  ;;  %v867_v13 = vrot.slane %v866_v9, 1 }
 0x423   :  { %v874_v14 = vrot.slane %v873_v10, 1  ;;  %v857_v15 = vadd.f32 %v856_v11, %v855_v6 }
 0x424   :  { %v868_v16 = vadd.f32 %v867_v13, %v866_v9  ;;  %v876_v17 = vmul.f32 0.125, %v850_v12 }
 0x425   :  { %v875_v18 = vadd.f32 %v874_v14, %v873_v10  ;;  %v877_v19 = vmul.f32 0.125, %v857_v15 }
 0x426   :  { %v878_v20 = vmul.f32 0.125, %v868_v16  ;;  %v880_v21 = vmul.f32 %v876_v17, %v876_v17  ;;  %v888_v22 = vsub.f32 %v842_v44, %v876_v17  ;;  %v886_v23 = vsub.f32 %v836_v41, %v876_v17  ;;  %v3205_v44 = vld [vmem:[%s4040_s1 + $0x510] ss:$8 sps:$4 sm:$0xff]  }
 0x427   :  { %v879_v24 = vmul.f32 0.125, %v875_v18  ;;  %v881_v25 = vmul.f32 %v877_v19, %v877_v19  ;;  %v887_v26 = vsub.f32 %v837_v43, %v877_v19  ;;  %v889_v27 = vsub.f32 %v843_v46, %v877_v19  ;;  %v3204_v43 = vld [vmem:[%s4040_s1 + $0x500] ss:$8 sps:$4 sm:$0xff]   ;;  %v3207_v46 = vld [vmem:[%s4040_s1 + $0x530] ss:$8 sps:$4 sm:$0xff]  }
 0x428   :  { %v882_v28 = vsub.f32 %v878_v20, %v880_v21 }
 0x429   :  { %v883_v29 = vsub.f32 %v879_v24, %v881_v25 }
 0x42a   :  { %v884_v30 = vmax.f32 %v882_v28, 0.0 }
 0x42b   :  { %v885_v31 = vmax.f32 %v883_v29, 0.0 }
 0x42c   :  { %v890_v32 = vadd.f32 1e-05, %v884_v30 }
 0x42d   :  { %v891_v33 = vadd.f32 1e-05, %v885_v31 }
 0x42e   :  { %3334 = vrsqrt.f32 %v890_v32  ;;  %v3212_v32 = vld [vmem:[%s4040_s1 + $0x600] ss:$8 sps:$4 sm:$0xff]  }
 0x42f   :  { %3336 = vrsqrt.f32 %v891_v33  ;;  %3038 = vmatpush3.bf16.msra.mxu1 %v3212_v32  ;;  %v3213_v33 = vld [vmem:[%s4040_s1 + $0x610] ss:$8 sps:$4 sm:$0xff]   ;;  %v3246_v32 = vld [vmem:[%s4040_s1 + $0x804] ss:$8 sps:$4 sm:$0xff]  }
 0x430   :  { %3039 = vmatprep.subr.bf16.mxu1 %v3356_v0 }
 0x433   :  { %3040 = vmatpush3.bf16.msra.mxu1 %v3213_v33  ;;  %v3249_v33 = vld [vmem:[%s4040_s1 + $0x814] ss:$8 sps:$4 sm:$0xff]  }
 0x434   :  { %3041 = vmatprep.subr.bf16.mxu1 %v3356_v0 }
 0x438   :  { %v3335_v34 = vpop.eup %3334 }
 0x439   :  { %v3337_v36 = vpop.eup %3336  ;;  %v894_v37 = vmul.f32 %v3335_v34, %v886_v23  ;;  %v896_v38 = vmul.f32 %v3335_v34, %v888_v22  ;;  %v3214_v34 = vld [vmem:[%s4040_s1 + $0x620] ss:$8 sps:$4 sm:$0xff]  }
 0x43a   :  { %v895_v39 = vmul.f32 %v3337_v36, %v887_v26  ;;  %v897_v40 = vmul.f32 %v3337_v36, %v889_v27  ;;  %3042 = vmatpush3.bf16.msra.mxu1 %v3214_v34  ;;  %v3216_v36 = vld [vmem:[%s4040_s1 + $0x640] ss:$8 sps:$4 sm:$0xff]   ;;  %v3247_v34 = vld [vmem:[%s4040_s1 + $0x810] ss:$8 sps:$4 sm:$0xff]  }
 0x43b   :  { %v933_v42 = vpack.c.bf16 %v896_v38, %v894_v37  ;;  %3043 = vmatprep.subr.bf16.mxu1 %v3356_v0  ;;  %v3217_v37 = vld [vmem:[%s4040_s1 + $0x650] ss:$8 sps:$4 sm:$0xff]   ;;  %v3218_v38 = vld [vmem:[%s4040_s1 + $0x660] ss:$8 sps:$4 sm:$0xff]  }
 0x43c   :  { %v934_v41 = vpack.c.bf16 %v897_v40, %v895_v39  ;;  %v3219_v39 = vld [vmem:[%s4040_s1 + $0x670] ss:$8 sps:$4 sm:$0xff]   ;;  %v2644_v40 = vld [vmem:[%s4042_s2 + $0xa] ss:$0 sm:$0xff] }
 0x43e   :  { %1069 = vmatprep.mubr.bf16.mxu0 %v934_v41 }
 0x43f   :  { %1070 = vmatmul.mubr.bf16.vlgmr.msra.gmra.mrb[8].mxu0 %v933_v42 }
 0x440   :  { %3033 = vmatprep.mubr.msk.bf16.mxu0 %vm3357_vm0, %v3356_v0  ;;  %3018 = vmatpush3.bf16.msra.mxu0 %v3204_v43 }
 0x441   :  { %3019 = vmatprep.subr.bf16.mxu0 %v3356_v0 }
 0x444   :  { %3020 = vmatpush3.bf16.msra.mxu0 %v3205_v44 }
 0x445   :  { %3021 = vmatprep.subr.bf16.mxu0 %v3356_v0 }
 0x448   :  { %3022 = vmatpush3.bf16.msra.mxu0 %v3206_v45 }
 0x449   :  { %3023 = vmatprep.subr.bf16.mxu0 %v3356_v0 }
 0x44c   :  { %3024 = vmatpush3.bf16.msra.mxu0 %v3207_v46 }
 0x44d   :  { %3025 = vmatprep.subr.bf16.mxu0 %v3356_v0 }
 0x450   :  { %3026 = vmatpush3.bf16.msra.mxu0 %v3208_v47 }
 0x451   :  { %3027 = vmatprep.subr.bf16.mxu0 %v3356_v0 }
 0x454   :  { %3028 = vmatpush3.bf16.msra.mxu0 %v3209_v48 }
 0x455   :  { %3029 = vmatprep.subr.bf16.mxu0 %v3356_v0 }
 0x458   :  { %3030 = vmatpush3.bf16.msra.mxu0 %v3210_v49 }
 0x459   :  { %3031 = vmatprep.subr.bf16.mxu0 %v3356_v0 }
 0x45c   :  { %3032 = vmatpush3.bf16.msra.mxu0 %v3211_v50 }
 0x512   :  { %v2913_v51 = vpop.f32.mrb[8].mxu0 }
 0x513   :  { %v2914_v54 = vpop.f32.mrb[9].mxu0 }
 0x514   :  { %v2915_v56 = vadd.f32 %v2914_v54, %v2913_v51  ;;  %v2916_v57 = vpop.f32.mrb[10].mxu0 }
 0x515   :  { %v2917_v58 = vpop.f32.mrb[11].mxu0 }
 0x516   :  { %v1072_v59 = vadd.f32 %v2915_v56, %v2610_v52  ;;  %v2918_v60 = vadd.f32 %v2917_v58, %v2916_v57 }
 0x518   :  { %v1080_v61 = vmul.f32 0.2, %v1072_v59  ;;  %v1075_v62 = vadd.f32 %v2918_v60, %v2610_v52  ;;  %vm1078_vm13 = vcmp.ge.f32.partialorder %v1072_v59, 0.0 }
 0x51a   :  { %vm1079_vm14 = vcmp.ge.f32.partialorder %v1075_v62, 0.0  ;;  %v1081_v63 = vmul.f32 0.2, %v1075_v62  ;;  %v1082_v1 = vsel %vm1078_vm13, %v1072_v59, %v1080_v61 }
 0x51b   :  { %v1093_v4 = vmul.f32 %v1082_v1, %v1082_v1 }
 0x51c   :  { %v1083_v2 = vsel %vm1079_vm14, %v1075_v62, %v1081_v63 }
 0x51d   :  { %v1085_v3 = vmul.f32 0.0, %v1083_v2 }
 0x51f   :  { %v1086_v5 = vadd.f32 %v1085_v3, %v1082_v1  ;;  %v1094_v6 = vmul.f32 %v1085_v3, %v1085_v3 }
 0x521   :  { %v1087_v8 = vrot.slane %v1086_v5, 4  ;;  %v1095_v7 = vadd.f32 %v1094_v6, %v1093_v4 }
 0x523   :  { %v1088_v9 = vadd.f32 %v1087_v8, %v1086_v5  ;;  %v1096_v10 = vrot.slane %v1095_v7, 4 }
 0x525   :  { %v1089_v11 = vrot.slane %v1088_v9, 2  ;;  %v1097_v12 = vadd.f32 %v1096_v10, %v1095_v7 }
 0x527   :  { %v1090_v13 = vadd.f32 %v1089_v11, %v1088_v9  ;;  %v1098_v14 = vrot.slane %v1097_v12, 2 }
 0x529   :  { %v1091_v15 = vrot.slane %v1090_v13, 1  ;;  %v1099_v16 = vadd.f32 %v1098_v14, %v1097_v12 }
 0x52b   :  { %v1100_v17 = vrot.slane %v1099_v16, 1  ;;  %v1092_v18 = vadd.f32 %v1091_v15, %v1090_v13  ;;  %v3222_v15 = vld [vmem:[%s4040_s1 + $0x704] ss:$8 sps:$4 sm:$0xff]  }
 0x52c   :  { %1520 = vmatprep.subr.bf16.mxu0 %v3222_v15 }
 0x52d   :  { %v1101_v19 = vadd.f32 %v1100_v17, %v1099_v16  ;;  %v1102_v20 = vmul.f32 0.125, %v1092_v18  ;;  %v3220_v16 = vld [vmem:[%s4040_s1 + $0x700] ss:$8 sps:$4 sm:$0xff]   ;;  %v3225_v17 = vld [vmem:[%s4040_s1 + $0x714] ss:$8 sps:$4 sm:$0xff]  }
 0x52e   :  { %v3223_v18 = vld [vmem:[%s4040_s1 + $0x710] ss:$8 sps:$4 sm:$0xff]  }
 0x52f   :  { %v1103_v21 = vmul.f32 0.125, %v1101_v19  ;;  %v1104_v22 = vmul.f32 %v1102_v20, %v1102_v20  ;;  %v1107_v23 = vsub.f32 %v1082_v1, %v1102_v20  ;;  %v1108_v24 = vsub.f32 %v1085_v3, %v1102_v20  ;;  %v3228_v19 = vld [vmem:[%s4040_s1 + $0x724] ss:$8 sps:$4 sm:$0xff]   ;;  %v3226_v20 = vld [vmem:[%s4040_s1 + $0x720] ss:$8 sps:$4 sm:$0xff]  }
 0x531   :  { %v1105_v25 = vsub.f32 %v1103_v21, %v1104_v22  ;;  %v3231_v21 = vld [vmem:[%s4040_s1 + $0x734] ss:$8 sps:$4 sm:$0xff]   ;;  %v3229_v22 = vld [vmem:[%s4040_s1 + $0x730] ss:$8 sps:$4 sm:$0xff]  }
 0x533   :  { %v1106_v26 = vmax.f32 %v1105_v25, 0.0  ;;  %v3237_v25 = vld [vmem:[%s4040_s1 + $0x754] ss:$8 sps:$4 sm:$0xff]  }
 0x535   :  { %v1109_v27 = vadd.f32 1e-05, %v1106_v26  ;;  %v3235_v26 = vld [vmem:[%s4040_s1 + $0x750] ss:$8 sps:$4 sm:$0xff]  }
 0x537   :  { %3338 = vrsqrt.f32 %v1109_v27  ;;  %v3240_v27 = vld [vmem:[%s4040_s1 + $0x764] ss:$8 sps:$4 sm:$0xff]  }
 0x541   :  { %v3339_v28 = vpop.eup %3338 }
 0x542   :  { %v1111_v29 = vmul.f32 %v3339_v28, %v1107_v23  ;;  %v1112_v30 = vmul.f32 %v3339_v28, %v1108_v24  ;;  %v3232_v23 = vld [vmem:[%s4040_s1 + $0x740] ss:$8 sps:$4 sm:$0xff]   ;;  %v3234_v24 = vld [vmem:[%s4040_s1 + $0x744] ss:$8 sps:$4 sm:$0xff]  }
 0x543   :  { %v3238_v28 = vld [vmem:[%s4040_s1 + $0x760] ss:$8 sps:$4 sm:$0xff]  }
 0x544   :  { %v1132_v31 = vpack.c.bf16 %v1112_v30, %v1111_v29  ;;  %v3243_v29 = vld [vmem:[%s4040_s1 + $0x774] ss:$8 sps:$4 sm:$0xff]   ;;  %v3241_v30 = vld [vmem:[%s4040_s1 + $0x770] ss:$8 sps:$4 sm:$0xff]  }
 0x546   :  { %3034 = vmatmul.mubr.bf16.vlgmr.msra.gmra.mrb[12].mxu0 %v1132_v31  ;;  %v3244_v31 = vld [vmem:[%s4040_s1 + $0x800] ss:$8 sps:$4 sm:$0xff]  }
 0x547   :  { %1552 = vmatprep.mubr.bf16.mxu0 %v3358_v35  ;;  %v3215_v35 = vld [vmem:[%s4040_s1 + $0x630] ss:$8 sps:$4 sm:$0xff]   ;;  %1521 = vmatpush1.bf16.msra.mxu0 %v3220_v16 }
 0x548   :  { %3044 = vmatpush3.bf16.msra.mxu1 %v3215_v35  ;;  %1522 = vmatprep.subr.bf16.mxu0 %v3225_v17  ;;  %v3252_v35 = vld [vmem:[%s4040_s1 + $0x824] ss:$8 sps:$4 sm:$0xff]  }
 0x549   :  { %3045 = vmatprep.subr.bf16.mxu1 %v3356_v0 }
 0x54b   :  { %1523 = vmatpush1.bf16.msra.mxu0 %v3223_v18  ;;  %v3258_v18 = vld [vmem:[%s4040_s1 + $0x844] ss:$8 sps:$4 sm:$0xff]  }
 0x54c   :  { %3046 = vmatpush3.bf16.msra.mxu1 %v3216_v36  ;;  %1524 = vmatprep.subr.bf16.mxu0 %v3228_v19  ;;  %v3250_v36 = vld [vmem:[%s4040_s1 + $0x820] ss:$8 sps:$4 sm:$0xff]  }
 0x54d   :  { %3047 = vmatprep.subr.bf16.mxu1 %v3356_v0  ;;  %v3256_v19 = vld [vmem:[%s4040_s1 + $0x840] ss:$8 sps:$4 sm:$0xff]  }
 0x54f   :  { %1525 = vmatpush1.bf16.msra.mxu0 %v3226_v20  ;;  %v3261_v20 = vld [vmem:[%s4040_s1 + $0x854] ss:$8 sps:$4 sm:$0xff]  }
 0x550   :  { %3048 = vmatpush3.bf16.msra.mxu1 %v3217_v37  ;;  %1526 = vmatprep.subr.bf16.mxu0 %v3231_v21  ;;  %v3255_v37 = vld [vmem:[%s4040_s1 + $0x834] ss:$8 sps:$4 sm:$0xff]   ;;  %v3259_v21 = vld [vmem:[%s4040_s1 + $0x850] ss:$8 sps:$4 sm:$0xff]  }
 0x551   :  { %3049 = vmatprep.subr.bf16.mxu1 %v3356_v0 }
 0x553   :  { %1527 = vmatpush1.bf16.msra.mxu0 %v3229_v22  ;;  %v3264_v22 = vld [vmem:[%s4040_s1 + $0x864] ss:$8 sps:$4 sm:$0xff]  }
 0x554   :  { %3050 = vmatpush3.bf16.msra.mxu1 %v3218_v38  ;;  %1528 = vmatprep.subr.bf16.mxu0 %v3234_v24  ;;  %v3253_v38 = vld [vmem:[%s4040_s1 + $0x830] ss:$8 sps:$4 sm:$0xff]   ;;  %v3267_v24 = vld [vmem:[%s4040_s1 + $0x874] ss:$8 sps:$4 sm:$0xff]  }
 0x555   :  { %3051 = vmatprep.subr.bf16.mxu1 %v3356_v0 }
 0x557   :  { %1529 = vmatpush1.bf16.msra.mxu0 %v3232_v23  ;;  %v3262_v23 = vld [vmem:[%s4040_s1 + $0x860] ss:$8 sps:$4 sm:$0xff]  }
 0x558   :  { %3052 = vmatpush3.bf16.msra.mxu1 %v3219_v39  ;;  %1530 = vmatprep.subr.bf16.mxu0 %v3237_v25  ;;  %v2670_v39 = vld [vmem:[%s4042_s2 + $0xc] ss:$0 sm:$0xff]  ;;  %v3265_v25 = vld [vmem:[%s4040_s1 + $0x870] ss:$8 sps:$4 sm:$0xff]  }
 0x559   :  { %1841 = vmatprep.subr.bf16.mxu1 %v3246_v32  ;;  %v3279_v32 = vld [vmem:[%s4040_s1 + $0x8b4] ss:$8 sps:$4 sm:$0xff]  }
 0x55b   :  { %1531 = vmatpush1.bf16.msra.mxu0 %v3235_v26  ;;  %v3270_v26 = vld [vmem:[%s4040_s1 + $0x884] ss:$8 sps:$4 sm:$0xff]  }
 0x55c   :  { %1532 = vmatprep.subr.bf16.mxu0 %v3240_v27  ;;  %v3268_v27 = vld [vmem:[%s4040_s1 + $0x880] ss:$8 sps:$4 sm:$0xff]  }
 0x55f   :  { %1533 = vmatpush1.bf16.msra.mxu0 %v3238_v28  ;;  %v3273_v28 = vld [vmem:[%s4040_s1 + $0x894] ss:$8 sps:$4 sm:$0xff]  }
 0x560   :  { %1534 = vmatprep.subr.bf16.mxu0 %v3243_v29  ;;  %v3271_v29 = vld [vmem:[%s4040_s1 + $0x890] ss:$8 sps:$4 sm:$0xff]  }
 0x563   :  { %1535 = vmatpush1.bf16.msra.mxu0 %v3241_v30  ;;  %v3276_v30 = vld [vmem:[%s4040_s1 + $0x8a4] ss:$8 sps:$4 sm:$0xff]  }
 0x619   :  { %v1221_v42 = vpop.f32.mrb[12].mxu0 }
 0x61a   :  { %v1222_v41 = vadd.f32 %v2644_v40, %v1221_v42  ;;  %v3035_v43 = vpop.f32.mrb[13].mxu0 }
 0x61b   :  { %v1224_v44 = vpop.f32.mrb[14].mxu0 }
 0x61c   :  { %1230 = vst [vmem:[%s4043_s3] sm:$0xff] %v1222_v41  ;;  %v1225_v45 = vadd.f32 %v2644_v40, %v1224_v44  ;;  %v3036_v46 = vpop.f32.mrb[15].mxu0  ;;  %v1239_v48 = vmul.f32 %v1222_v41, %v1222_v41 }
 0x61e   :  { %v1229_v47 = vmul.f32 0.0, %v1225_v45 }
 0x620   :  { %1231 = vst [vmem:[%s4043_s3 + $0x8] sm:$0xff] %v1229_v47  ;;  %v1232_v49 = vadd.f32 %v1229_v47, %v1222_v41  ;;  %v1240_v50 = vmul.f32 %v1229_v47, %v1229_v47 }
 0x622   :  { %v1233_v51 = vrot.slane %v1232_v49, 4  ;;  %v1241_v52 = vadd.f32 %v1240_v50, %v1239_v48 }
 0x624   :  { %v1234_v54 = vadd.f32 %v1233_v51, %v1232_v49  ;;  %v1242_v56 = vrot.slane %v1241_v52, 4 }
 0x626   :  { %v1235_v57 = vrot.slane %v1234_v54, 2  ;;  %v1243_v58 = vadd.f32 %v1242_v56, %v1241_v52 }
 0x628   :  { %v1236_v59 = vadd.f32 %v1235_v57, %v1234_v54  ;;  %v1244_v60 = vrot.slane %v1243_v58, 2 }
 0x62a   :  { %v1237_v61 = vrot.slane %v1236_v59, 1  ;;  %v1245_v62 = vadd.f32 %v1244_v60, %v1243_v58 }
 0x62c   :  { %v1238_v63 = vadd.f32 %v1237_v61, %v1236_v59  ;;  %v1246_v1 = vrot.slane %v1245_v62, 1 }
 0x62e   :  { %v1247_v2 = vadd.f32 %v1246_v1, %v1245_v62  ;;  %v1248_v3 = vmul.f32 0.125, %v1238_v63 }
 0x630   :  { %v1249_v4 = vmul.f32 0.125, %v1247_v2  ;;  %v1250_v5 = vmul.f32 %v1248_v3, %v1248_v3  ;;  %v1254_v6 = vsub.f32 %v1229_v47, %v1248_v3  ;;  %v1253_v8 = vsub.f32 %v1222_v41, %v1248_v3 }
 0x632   :  { %v1251_v7 = vsub.f32 %v1249_v4, %v1250_v5 }
 0x634   :  { %v1252_v9 = vmax.f32 %v1251_v7, 0.0 }
 0x636   :  { %v1255_v10 = vadd.f32 1e-05, %v1252_v9 }
 0x638   :  { %3340 = vrsqrt.f32 %v1255_v10 }
 0x642   :  { %v3341_v11 = vpop.eup %3340 }
 0x643   :  { %v1257_v12 = vmul.f32 %v3341_v11, %v1253_v8  ;;  %v1258_v13 = vmul.f32 %v3341_v11, %v1254_v6 }
 0x645   :  { %v1278_v14 = vpack.c.bf16 %v1258_v13, %v1257_v12 }
 0x647   :  { %3054 = vmatmul.mubr.bf16.vlgmr.msra.gmra.mrb[8].mxu1 %v1278_v14 }
 0x648   :  { %1842 = vmatpush1.bf16.msra.mxu1 %v3244_v31  ;;  %v3274_v31 = vld [vmem:[%s4040_s1 + $0x8a0] ss:$8 sps:$4 sm:$0xff]  }
 0x649   :  { %1843 = vmatprep.subr.bf16.mxu1 %v3249_v33  ;;  %v3277_v33 = vld [vmem:[%s4040_s1 + $0x8b0] ss:$8 sps:$4 sm:$0xff]  }
 0x64c   :  { %1844 = vmatpush1.bf16.msra.mxu1 %v3247_v34  ;;  %v3282_v34 = vld [vmem:[%s4040_s1 + $0x8c4] ss:$8 sps:$4 sm:$0xff]  }
 0x64d   :  { %1845 = vmatprep.subr.bf16.mxu1 %v3252_v35  ;;  %v3280_v35 = vld [vmem:[%s4040_s1 + $0x8c0] ss:$8 sps:$4 sm:$0xff]  }
 0x650   :  { %1846 = vmatpush1.bf16.msra.mxu1 %v3250_v36  ;;  %v3285_v36 = vld [vmem:[%s4040_s1 + $0x8d4] ss:$8 sps:$4 sm:$0xff]  }
 0x651   :  { %1847 = vmatprep.subr.bf16.mxu1 %v3255_v37  ;;  %v3283_v37 = vld [vmem:[%s4040_s1 + $0x8d0] ss:$8 sps:$4 sm:$0xff]  }
 0x654   :  { %1848 = vmatpush1.bf16.msra.mxu1 %v3253_v38  ;;  %v3288_v38 = vld [vmem:[%s4040_s1 + $0x8e4] ss:$8 sps:$4 sm:$0xff]  }
 0x655   :  { %1849 = vmatprep.subr.bf16.mxu1 %v3258_v18 }
 0x658   :  { %1850 = vmatpush1.bf16.msra.mxu1 %v3256_v19 }
 0x659   :  { %1851 = vmatprep.subr.bf16.mxu1 %v3261_v20 }
 0x65c   :  { %1852 = vmatpush1.bf16.msra.mxu1 %v3259_v21 }
 0x65d   :  { %1853 = vmatprep.subr.bf16.mxu1 %v3264_v22 }
 0x660   :  { %1854 = vmatpush1.bf16.msra.mxu1 %v3262_v23 }
 0x661   :  { %1855 = vmatprep.subr.bf16.mxu1 %v3267_v24 }
 0x664   :  { %1856 = vmatpush1.bf16.msra.mxu1 %v3265_v25 }
 0x665   :  { %1857 = vmatprep.subr.bf16.mxu1 %v3270_v26 }
 0x668   :  { %1858 = vmatpush1.bf16.msra.mxu1 %v3268_v27 }
 0x669   :  { %1859 = vmatprep.subr.bf16.mxu1 %v3273_v28 }
 0x66c   :  { %1860 = vmatpush1.bf16.msra.mxu1 %v3271_v29 }
 0x66d   :  { %1861 = vmatprep.subr.bf16.mxu1 %v3276_v30 }
 0x670   :  { %1862 = vmatpush1.bf16.msra.mxu1 %v3274_v31 }
 0x671   :  { %1863 = vmatprep.subr.bf16.mxu1 %v3279_v32 }
 0x674   :  { %1864 = vmatpush1.bf16.msra.mxu1 %v3277_v33 }
 0x675   :  { %1865 = vmatprep.subr.bf16.mxu1 %v3282_v34 }
 0x678   :  { %1866 = vmatpush1.bf16.msra.mxu1 %v3280_v35 }
 0x679   :  { %1867 = vmatprep.subr.bf16.mxu1 %v3285_v36 }
 0x67c   :  { %1868 = vmatpush1.bf16.msra.mxu1 %v3283_v37 }
 0x67d   :  { %1869 = vmatprep.subr.bf16.mxu1 %v3288_v38 }
 0x71a   :  { %v1367_v40 = vpop.f32.mrb[8].mxu1 }
 0x71b   :  { %v1368_v42 = vadd.f32 %v2670_v39, %v1367_v40  ;;  %v3055_v41 = vpop.f32.mrb[9].mxu1  ;;  %v3291_v40 = vld [vmem:[%s4040_s1 + $0x8f4] ss:$8 sps:$4 sm:$0xff]  }
 0x71c   :  { %v1370_v43 = vpop.f32.mrb[10].mxu1  ;;  %v2695_v41 = vld [vmem:[%s4042_s2 + $0xe] sm:$0x3] }
 0x71d   :  { %v1376_v44 = vmul.f32 0.2, %v1368_v42  ;;  %v1371_v45 = vadd.f32 %v2670_v39, %v1370_v43  ;;  %v3056_v46 = vpop.f32.mrb[11].mxu1  ;;  %vm1374_vm15 = vcmp.ge.f32.partialorder %v1368_v42, 0.0  ;;  %v3286_v39 = vld [vmem:[%s4040_s1 + $0x8e0] ss:$8 sps:$4 sm:$0xff]   ;;  %v1433_v43 = vrot.slane %v2695_v41, %v3610_v53 }
 0x71e   :  { %1870 = vmatpush1.bf16.msra.mxu1 %v3286_v39 }
 0x71f   :  { %vm1375_vm1 = vcmp.ge.f32.partialorder %v1371_v45, 0.0  ;;  %v1377_v47 = vmul.f32 0.2, %v1371_v45  ;;  %v1378_v48 = vsel %vm1374_vm15, %v1368_v42, %v1376_v44  ;;  %v3289_v42 = vld [vmem:[%s4040_s1 + $0x8f0] ss:$8 sps:$4 sm:$0xff]   ;;  %1871 = vmatprep.subr.bf16.mxu1 %v3291_v40  ;;  %v1437_v44 = vrot.slane %v2695_v41, %v3615_v55 }
 0x720   :  { %v1389_v51 = vmul.f32 %v1378_v48, %v1378_v48 }
 0x721   :  { %v1379_v49 = vsel %vm1375_vm1, %v1371_v45, %v1377_v47 }
 0x722   :  { %v1381_v50 = vmul.f32 0.0, %v1379_v49  ;;  %1872 = vmatpush1.bf16.msra.mxu1 %v3289_v42 }
 0x723   :  { %3077 = vmatprep.subr.bf16.mxu1 %v3356_v0 }
 0x724   :  { %v1382_v52 = vadd.f32 %v1381_v50, %v1378_v48  ;;  %v1390_v54 = vmul.f32 %v1381_v50, %v1381_v50 }
 0x726   :  { %v1383_v56 = vrot.slane %v1382_v52, 4  ;;  %v1391_v57 = vadd.f32 %v1390_v54, %v1389_v51 }
 0x728   :  { %v1384_v58 = vadd.f32 %v1383_v56, %v1382_v52  ;;  %v1392_v59 = vrot.slane %v1391_v57, 4 }
 0x72a   :  { %v1385_v60 = vrot.slane %v1384_v58, 2  ;;  %v1393_v61 = vadd.f32 %v1392_v59, %v1391_v57 }
 0x72c   :  { %v1386_v62 = vadd.f32 %v1385_v60, %v1384_v58  ;;  %v1394_v63 = vrot.slane %v1393_v61, 2 }
 0x72e   :  { %v1387_v1 = vrot.slane %v1386_v62, 1  ;;  %v1395_v2 = vadd.f32 %v1394_v63, %v1393_v61 }
 0x730   :  { %v1388_v3 = vadd.f32 %v1387_v1, %v1386_v62  ;;  %v1396_v4 = vrot.slane %v1395_v2, 1 }
 0x732   :  { %v1397_v5 = vadd.f32 %v1396_v4, %v1395_v2  ;;  %v1398_v6 = vmul.f32 0.125, %v1388_v3 }
 0x734   :  { %v1399_v8 = vmul.f32 0.125, %v1397_v5  ;;  %v1400_v7 = vmul.f32 %v1398_v6, %v1398_v6  ;;  %v1404_v9 = vsub.f32 %v1381_v50, %v1398_v6  ;;  %v1403_v10 = vsub.f32 %v1378_v48, %v1398_v6 }
 0x736   :  { %v1401_v11 = vsub.f32 %v1399_v8, %v1400_v7 }
 0x738   :  { %v1402_v12 = vmax.f32 %v1401_v11, 0.0 }
 0x73a   :  { %v1405_v13 = vadd.f32 1e-05, %v1402_v12 }
 0x73c   :  { %3342 = vrsqrt.f32 %v1405_v13 }
 0x746   :  { %v3343_v14 = vpop.eup %3342 }
 0x747   :  { %v1407_v15 = vmul.f32 %v3343_v14, %v1403_v10  ;;  %v1408_v16 = vmul.f32 %v3343_v14, %v1404_v9 }
 0x749   :  { %v1428_v17 = vpack.c.bf16 %v1408_v16, %v1407_v15 }
 0x74b   :  { %1553 = vmatmul.mubr.bf16.vlgmr.msra.gmra.mrb[16].mxu0 %v1428_v17 }
 0x81e   :  { %v1554_v45 = vpop.f32.mrb[16].mxu0 }
 0x81f   :  { %v1555_v46 = vadd.f32 %v1554_v45, %v1433_v43  ;;  %v1556_v47 = vpop.f32.mrb[17].mxu0 }
 0x820   :  { %v1557_v48 = vadd.f32 %v1556_v47, %v1437_v44  ;;  %v1558_v49 = vpop.f32.mrb[18].mxu0 }
 0x821   :  { %v1567_v50 = vmul.f32 0.2, %v1555_v46  ;;  %v1559_v51 = vadd.f32 %v1558_v49, %v1433_v43  ;;  %v1560_v52 = vpop.f32.mrb[19].mxu0  ;;  %vm1563_vm2 = vcmp.ge.f32.partialorder %v1555_v46, 0.0 }
 0x822   :  { %v1568_v54 = vmul.f32 0.2, %v1557_v48  ;;  %v1561_v56 = vadd.f32 %v1560_v52, %v1437_v44  ;;  %vm1564_vm3 = vcmp.ge.f32.partialorder %v1557_v48, 0.0 }
 0x823   :  { %vm1565_vm4 = vcmp.ge.f32.partialorder %v1559_v51, 0.0  ;;  %v1569_v57 = vmul.f32 0.2, %v1559_v51  ;;  %v1571_v59 = vsel %vm1563_vm2, %v1555_v46, %v1567_v50 }
 0x824   :  { %vm1566_vm5 = vcmp.ge.f32.partialorder %v1561_v56, 0.0  ;;  %v1570_v58 = vmul.f32 0.2, %v1561_v56  ;;  %v1572_v61 = vsel %vm1564_vm3, %v1557_v48, %v1568_v54  ;;  %v1593_v2 = vmul.f32 %v1571_v59, %v1571_v59 }
 0x825   :  { %v1573_v60 = vsel %vm1565_vm4, %v1559_v51, %v1569_v57  ;;  %v1594_v5 = vmul.f32 %v1572_v61, %v1572_v61 }
 0x826   :  { %v1577_v62 = vmul.f32 0.0, %v1573_v60  ;;  %v1574_v63 = vsel %vm1566_vm5, %v1561_v56, %v1570_v58  ;;  %v3292_v60 = vld [vmem:[%s4040_s1 + $0x980] ss:$8 sps:$4 sm:$0xff]  }
 0x827   :  { %v1578_v1 = vmul.f32 0.0, %v1574_v63  ;;  %2937 = vmatprep.subr.bf16.mxu0 %v3292_v60  ;;  %v3295_v63 = vld [vmem:[%s4040_s1 + $0x910] ss:$8 sps:$4 sm:$0xff]  }
 0x828   :  { %v1579_v3 = vadd.f32 %v1577_v62, %v1571_v59  ;;  %v1595_v4 = vmul.f32 %v1577_v62, %v1577_v62 }
 0x829   :  { %v1586_v6 = vadd.f32 %v1578_v1, %v1572_v61  ;;  %v1596_v8 = vmul.f32 %v1578_v1, %v1578_v1 }
 0x82a   :  { %v1580_v7 = vrot.slane %v1579_v3, 4  ;;  %v1597_v9 = vadd.f32 %v1595_v4, %v1593_v2  ;;  %v3297_v2 = vld [vmem:[%s4040_s1 + $0x920] ss:$8 sps:$4 sm:$0xff]   ;;  %v3299_v4 = vld [vmem:[%s4040_s1 + $0x930] ss:$8 sps:$4 sm:$0xff]  }
 0x82b   :  { %v1587_v10 = vrot.slane %v1586_v6, 4  ;;  %v1604_v11 = vadd.f32 %v1596_v8, %v1594_v5  ;;  %v3300_v5 = vld [vmem:[%s4040_s1 + $0x9c0] ss:$8 sps:$4 sm:$0xff]   ;;  %v3302_v8 = vld [vmem:[%s4040_s1 + $0x9d0] ss:$8 sps:$4 sm:$0xff]  }
 0x82c   :  { %v1581_v12 = vadd.f32 %v1580_v7, %v1579_v3  ;;  %v1598_v13 = vrot.slane %v1597_v9, 4  ;;  %v3298_v3 = vld [vmem:[%s4040_s1 + $0x9b0] ss:$8 sps:$4 sm:$0xff]  }
 0x82d   :  { %v1588_v14 = vadd.f32 %v1587_v10, %v1586_v6  ;;  %v1605_v15 = vrot.slane %v1604_v11, 4  ;;  %v3301_v6 = vld [vmem:[%s4040_s1 + $0x940] ss:$8 sps:$4 sm:$0xff]   ;;  %v3303_v7 = vld [vmem:[%s4040_s1 + $0x950] ss:$8 sps:$4 sm:$0xff]  }
 0x82e   :  { %v1582_v16 = vrot.slane %v1581_v12, 2  ;;  %v1599_v17 = vadd.f32 %v1598_v13, %v1597_v9  ;;  %v3304_v9 = vld [vmem:[%s4040_s1 + $0x9e0] ss:$8 sps:$4 sm:$0xff]   ;;  %v2744_v13 = vld [vmem:[%s4042_s2 + $0x10] sm:$0x3] }
 0x82f   :  { %v1589_v18 = vrot.slane %v1588_v14, 2  ;;  %v1606_v19 = vadd.f32 %v1605_v15, %v1604_v11  ;;  %v3305_v10 = vld [vmem:[%s4040_s1 + $0x960] ss:$8 sps:$4 sm:$0xff]   ;;  %v3306_v11 = vld [vmem:[%s4040_s1 + $0x9f0] ss:$8 sps:$4 sm:$0xff]   ;;  %v1678_v15 = vrot.slane %v2744_v13, %v3615_v55 }
 0x830   :  { %v1583_v20 = vadd.f32 %v1582_v16, %v1581_v12  ;;  %v1600_v21 = vrot.slane %v1599_v17, 2  ;;  %v3307_v12 = vld [vmem:[%s4040_s1 + $0x970] ss:$8 sps:$4 sm:$0xff]  }
 0x831   :  { %v1590_v22 = vadd.f32 %v1589_v18, %v1588_v14  ;;  %v1607_v23 = vrot.slane %v1606_v19, 2  ;;  %v1674_v14 = vrot.slane %v2744_v13, %v3610_v53 }
 0x832   :  { %v1584_v24 = vrot.slane %v1583_v20, 1  ;;  %v1601_v25 = vadd.f32 %v1600_v21, %v1599_v17 }
 0x833   :  { %v1608_v26 = vadd.f32 %v1607_v23, %v1606_v19  ;;  %v1591_v27 = vrot.slane %v1590_v22, 1 }
 0x834   :  { %v1585_v28 = vadd.f32 %v1584_v24, %v1583_v20  ;;  %v1602_v29 = vrot.slane %v1601_v25, 1 }
 0x835   :  { %v1609_v30 = vrot.slane %v1608_v26, 1  ;;  %v1592_v31 = vadd.f32 %v1591_v27, %v1590_v22 }
 0x836   :  { %v1603_v32 = vadd.f32 %v1602_v29, %v1601_v25  ;;  %v1611_v33 = vmul.f32 0.125, %v1585_v28 }
 0x837   :  { %v1610_v34 = vadd.f32 %v1609_v30, %v1608_v26  ;;  %v1612_v35 = vmul.f32 0.125, %v1592_v31 }
 0x838   :  { %v1613_v36 = vmul.f32 0.125, %v1603_v32  ;;  %v1615_v37 = vmul.f32 %v1611_v33, %v1611_v33  ;;  %v1623_v38 = vsub.f32 %v1577_v62, %v1611_v33  ;;  %v1621_v39 = vsub.f32 %v1571_v59, %v1611_v33  ;;  %v3294_v62 = vld [vmem:[%s4040_s1 + $0x990] ss:$8 sps:$4 sm:$0xff]  }
 0x839   :  { %v1614_v40 = vmul.f32 0.125, %v1610_v34  ;;  %v1616_v42 = vmul.f32 %v1612_v35, %v1612_v35  ;;  %v1622_v41 = vsub.f32 %v1572_v61, %v1612_v35  ;;  %v1624_v43 = vsub.f32 %v1578_v1, %v1612_v35  ;;  %v3293_v61 = vld [vmem:[%s4040_s1 + $0x900] ss:$8 sps:$4 sm:$0xff]  }
 0x83a   :  { %v1617_v44 = vsub.f32 %v1613_v36, %v1615_v37  ;;  %2938 = vmatpush3.bf16.msra.mxu0 %v3293_v61  ;;  %v3296_v1 = vld [vmem:[%s4040_s1 + $0x9a0] ss:$8 sps:$4 sm:$0xff]  }
 0x83b   :  { %v1618_v45 = vsub.f32 %v1614_v40, %v1616_v42  ;;  %2939 = vmatprep.subr.bf16.mxu0 %v3294_v62 }
 0x83c   :  { %v1619_v46 = vmax.f32 %v1617_v44, 0.0 }
 0x83d   :  { %v1620_v47 = vmax.f32 %v1618_v45, 0.0 }
 0x83e   :  { %v1625_v48 = vadd.f32 1e-05, %v1619_v46  ;;  %2940 = vmatpush3.bf16.msra.mxu0 %v3295_v63 }
 0x83f   :  { %v1626_v49 = vadd.f32 1e-05, %v1620_v47  ;;  %2941 = vmatprep.subr.bf16.mxu0 %v3296_v1 }
 0x840   :  { %3344 = vrsqrt.f32 %v1625_v48 }
 0x841   :  { %3346 = vrsqrt.f32 %v1626_v49 }
 0x842   :  { %2942 = vmatpush3.bf16.msra.mxu0 %v3297_v2 }
 0x843   :  { %2943 = vmatprep.subr.bf16.mxu0 %v3298_v3 }
 0x846   :  { %2944 = vmatpush3.bf16.msra.mxu0 %v3299_v4 }
 0x847   :  { %2945 = vmatprep.subr.bf16.mxu0 %v3300_v5 }
 0x84a   :  { %v3345_v50 = vpop.eup %3344  ;;  %2946 = vmatpush3.bf16.msra.mxu0 %v3301_v6 }
 0x84b   :  { %v3347_v51 = vpop.eup %3346  ;;  %v1629_v52 = vmul.f32 %v3345_v50, %v1621_v39  ;;  %v1631_v54 = vmul.f32 %v3345_v50, %v1623_v38  ;;  %2947 = vmatprep.subr.bf16.mxu0 %v3302_v8 }
 0x84c   :  { %v1630_v56 = vmul.f32 %v3347_v51, %v1622_v41  ;;  %v1632_v57 = vmul.f32 %v3347_v51, %v1624_v43 }
 0x84d   :  { %v1668_v58 = vpack.c.bf16 %v1631_v54, %v1629_v52 }
 0x84e   :  { %v1669_v59 = vpack.c.bf16 %v1632_v57, %v1630_v56  ;;  %2948 = vmatpush3.bf16.msra.mxu0 %v3303_v7 }
 0x84f   :  { %2949 = vmatprep.subr.bf16.mxu0 %v3304_v9 }
 0x850   :  { %1873 = vmatprep.mubr.bf16.mxu1 %v1669_v59 }
 0x851   :  { %1874 = vmatmul.mubr.bf16.vlgmr.msra.gmra.mrb[12].mxu1 %v1668_v58 }
 0x852   :  { %3093 = vmatprep.mubr.msk.bf16.mxu1 %vm3357_vm0, %v3356_v0  ;;  %2950 = vmatpush3.bf16.msra.mxu0 %v3305_v10 }
 0x853   :  { %2951 = vmatprep.subr.bf16.mxu0 %v3306_v11 }
 0x856   :  { %2952 = vmatpush3.bf16.msra.mxu0 %v3307_v12 }
 0x857   :  { %3057 = vmatprep.subr.bf16.mxu0 %v3356_v0 }
 0x924   :  { %v1875_v16 = vpop.f32.mrb[12].mxu1 }
 0x925   :  { %v1876_v17 = vadd.f32 %v1875_v16, %v1674_v14  ;;  %v1877_v18 = vpop.f32.mrb[13].mxu1 }
 0x926   :  { %v1878_v19 = vadd.f32 %v1877_v18, %v1678_v15  ;;  %v1879_v20 = vpop.f32.mrb[14].mxu1 }
 0x927   :  { %v1888_v21 = vmul.f32 0.2, %v1876_v17  ;;  %v1880_v22 = vadd.f32 %v1879_v20, %v1674_v14  ;;  %v1881_v23 = vpop.f32.mrb[15].mxu1  ;;  %vm1884_vm6 = vcmp.ge.f32.partialorder %v1876_v17, 0.0 }
 0x928   :  { %v1889_v24 = vmul.f32 0.2, %v1878_v19  ;;  %v1882_v25 = vadd.f32 %v1881_v23, %v1678_v15  ;;  %vm1885_vm7 = vcmp.ge.f32.partialorder %v1878_v19, 0.0 }
 0x929   :  { %vm1886_vm8 = vcmp.ge.f32.partialorder %v1880_v22, 0.0  ;;  %v1890_v26 = vmul.f32 0.2, %v1880_v22  ;;  %v1892_v28 = vsel %vm1884_vm6, %v1876_v17, %v1888_v21 }
 0x92a   :  { %vm1887_vm9 = vcmp.ge.f32.partialorder %v1882_v25, 0.0  ;;  %v1891_v27 = vmul.f32 0.2, %v1882_v25  ;;  %v1893_v29 = vsel %vm1885_vm7, %v1878_v19, %v1889_v24  ;;  %v1914_v32 = vmul.f32 %v1892_v28, %v1892_v28 }
 0x92b   :  { %v1894_v53 = vsel %vm1886_vm8, %v1880_v22, %v1890_v26  ;;  %v1915_v35 = vmul.f32 %v1893_v29, %v1893_v29 }
 0x92c   :  { %v1898_v55 = vmul.f32 0.0, %v1894_v53  ;;  %v1895_v30 = vsel %vm1887_vm9, %v1882_v25, %v1891_v27  ;;  %v3308_v27 = vld [vmem:[%s4040_s1 + $0xa00] ss:$8 sps:$4 sm:$0xff]  }
 0x92d   :  { %v1899_v31 = vmul.f32 0.0, %v1895_v30  ;;  %v3310_v53 = vld [vmem:[%s4040_s1 + $0xa20] ss:$8 sps:$4 sm:$0xff]   ;;  %v3313_v30 = vld [vmem:[%s4040_s1 + $0xa50] ss:$8 sps:$4 sm:$0xff]  }
 0x92e   :  { %v1900_v33 = vadd.f32 %v1898_v55, %v1892_v28  ;;  %v1916_v34 = vmul.f32 %v1898_v55, %v1898_v55 }
 0x92f   :  { %v1907_v36 = vadd.f32 %v1899_v31, %v1893_v29  ;;  %v1917_v37 = vmul.f32 %v1899_v31, %v1899_v31 }
 0x930   :  { %v1901_v38 = vrot.slane %v1900_v33, 4  ;;  %v1918_v39 = vadd.f32 %v1916_v34, %v1914_v32  ;;  %v3315_v32 = vld [vmem:[%s4040_s1 + $0xa70] ss:$8 sps:$4 sm:$0xff]  }
 0x931   :  { %v1908_v40 = vrot.slane %v1907_v36, 4  ;;  %v1925_v42 = vadd.f32 %v1917_v37, %v1915_v35  ;;  %v2810_v34 = vld [vmem:[%s4042_s2 + $0x12] ss:$0 sm:$0xff] }
 0x932   :  { %v1902_v41 = vadd.f32 %v1901_v38, %v1900_v33  ;;  %v1919_v43 = vrot.slane %v1918_v39, 4 }
 0x933   :  { %v1909_v44 = vadd.f32 %v1908_v40, %v1907_v36  ;;  %v1926_v45 = vrot.slane %v1925_v42, 4 }
 0x934   :  { %v1903_v46 = vrot.slane %v1902_v41, 2  ;;  %v1920_v47 = vadd.f32 %v1919_v43, %v1918_v39 }
 0x935   :  { %v1910_v48 = vrot.slane %v1909_v44, 2  ;;  %v1927_v49 = vadd.f32 %v1926_v45, %v1925_v42 }
 0x936   :  { %v1904_v50 = vadd.f32 %v1903_v46, %v1902_v41  ;;  %v1921_v51 = vrot.slane %v1920_v47, 2 }
 0x937   :  { %v1911_v52 = vadd.f32 %v1910_v48, %v1909_v44  ;;  %v1928_v54 = vrot.slane %v1927_v49, 2 }
 0x938   :  { %v1905_v56 = vrot.slane %v1904_v50, 1  ;;  %v1922_v57 = vadd.f32 %v1921_v51, %v1920_v47 }
 0x939   :  { %v1929_v58 = vadd.f32 %v1928_v54, %v1927_v49  ;;  %v1912_v59 = vrot.slane %v1911_v52, 1 }
 0x93a   :  { %v1906_v60 = vadd.f32 %v1905_v56, %v1904_v50  ;;  %v1923_v61 = vrot.slane %v1922_v57, 1 }
 0x93b   :  { %v1930_v62 = vrot.slane %v1929_v58, 1  ;;  %v1913_v63 = vadd.f32 %v1912_v59, %v1911_v52 }
 0x93c   :  { %v1924_v1 = vadd.f32 %v1923_v61, %v1922_v57  ;;  %v1932_v2 = vmul.f32 0.125, %v1906_v60 }
 0x93d   :  { %v1931_v3 = vadd.f32 %v1930_v62, %v1929_v58  ;;  %v1933_v4 = vmul.f32 0.125, %v1913_v63 }
 0x93e   :  { %v1934_v5 = vmul.f32 0.125, %v1924_v1  ;;  %v1936_v6 = vmul.f32 %v1932_v2, %v1932_v2  ;;  %v1944_v8 = vsub.f32 %v1898_v55, %v1932_v2  ;;  %v1942_v7 = vsub.f32 %v1892_v28, %v1932_v2  ;;  %v3309_v28 = vld [vmem:[%s4040_s1 + $0xa10] ss:$8 sps:$4 sm:$0xff]   ;;  %v3312_v55 = vld [vmem:[%s4040_s1 + $0xa40] ss:$8 sps:$4 sm:$0xff]  }
 0x93f   :  { %v1935_v9 = vmul.f32 0.125, %v1931_v3  ;;  %v1937_v10 = vmul.f32 %v1933_v4, %v1933_v4  ;;  %v1943_v11 = vsub.f32 %v1893_v29, %v1933_v4  ;;  %v1945_v12 = vsub.f32 %v1899_v31, %v1933_v4  ;;  %v3311_v29 = vld [vmem:[%s4040_s1 + $0xa30] ss:$8 sps:$4 sm:$0xff]   ;;  %v3314_v31 = vld [vmem:[%s4040_s1 + $0xa60] ss:$8 sps:$4 sm:$0xff]  }
 0x940   :  { %v1938_v13 = vsub.f32 %v1934_v5, %v1936_v6 }
 0x941   :  { %v1939_v14 = vsub.f32 %v1935_v9, %v1937_v10 }
 0x942   :  { %v1940_v15 = vmax.f32 %v1938_v13, 0.0 }
 0x943   :  { %v1941_v16 = vmax.f32 %v1939_v14, 0.0  ;;  %v3316_v14 = vld [vmem:[%s4040_s1 + $0xb00] ss:$8 sps:$4 sm:$0xff]  }
 0x944   :  { %v1946_v17 = vadd.f32 1e-05, %v1940_v15  ;;  %3078 = vmatpush3.bf16.msra.mxu1 %v3316_v14  ;;  %v3317_v15 = vld [vmem:[%s4040_s1 + $0xb10] ss:$8 sps:$4 sm:$0xff]  }
 0x945   :  { %v1947_v18 = vadd.f32 1e-05, %v1941_v16  ;;  %3079 = vmatprep.subr.bf16.mxu1 %v3356_v0  ;;  %v3318_v16 = vld [vmem:[%s4040_s1 + $0xb20] ss:$8 sps:$4 sm:$0xff]  }
 0x946   :  { %3348 = vrsqrt.f32 %v1946_v17  ;;  %v3319_v17 = vld [vmem:[%s4040_s1 + $0xb30] ss:$8 sps:$4 sm:$0xff]  }
 0x947   :  { %3350 = vrsqrt.f32 %v1947_v18  ;;  %v3320_v18 = vld [vmem:[%s4040_s1 + $0xb40] ss:$8 sps:$4 sm:$0xff]  }
 0x948   :  { %3080 = vmatpush3.bf16.msra.mxu1 %v3317_v15 }
 0x949   :  { %3081 = vmatprep.subr.bf16.mxu1 %v3356_v0 }
 0x94c   :  { %3082 = vmatpush3.bf16.msra.mxu1 %v3318_v16 }
 0x94d   :  { %3083 = vmatprep.subr.bf16.mxu1 %v3356_v0 }
 0x950   :  { %v3349_v19 = vpop.eup %3348  ;;  %3084 = vmatpush3.bf16.msra.mxu1 %v3319_v17 }
 0x951   :  { %v3351_v20 = vpop.eup %3350  ;;  %v1950_v21 = vmul.f32 %v3349_v19, %v1942_v7  ;;  %v1952_v22 = vmul.f32 %v3349_v19, %v1944_v8  ;;  %3085 = vmatprep.subr.bf16.mxu1 %v3356_v0  ;;  %v3321_v19 = vld [vmem:[%s4040_s1 + $0xb50] ss:$8 sps:$4 sm:$0xff]  }
 0x952   :  { %v1951_v23 = vmul.f32 %v3351_v20, %v1943_v11  ;;  %v1953_v24 = vmul.f32 %v3351_v20, %v1945_v12  ;;  %v3322_v20 = vld [vmem:[%s4040_s1 + $0xb60] ss:$8 sps:$4 sm:$0xff]  }
 0x953   :  { %v1989_v25 = vpack.c.bf16 %v1952_v22, %v1950_v21  ;;  %v3323_v21 = vld [vmem:[%s4040_s1 + $0xb70] ss:$8 sps:$4 sm:$0xff]   ;;  %v2844_v22 = vld [vmem:[%s4042_s2 + $0x14] ss:$0 sm:$0xff] }
 0x954   :  { %v1990_v26 = vpack.c.bf16 %v1953_v24, %v1951_v23  ;;  %3086 = vmatpush3.bf16.msra.mxu1 %v3320_v18 }
 0x955   :  { %3087 = vmatprep.subr.bf16.mxu1 %v3356_v0 }
 0x956   :  { %2125 = vmatprep.mubr.bf16.mxu0 %v1990_v26 }
 0x957   :  { %2126 = vmatmul.mubr.bf16.vlgmr.msra.gmra.mrb[20].mxu0 %v1989_v25 }
 0x958   :  { %3073 = vmatprep.mubr.msk.bf16.mxu0 %vm3357_vm0, %v3356_v0  ;;  %3058 = vmatpush3.bf16.msra.mxu0 %v3308_v27 }
 0x959   :  { %3059 = vmatprep.subr.bf16.mxu0 %v3356_v0  ;;  %3088 = vmatpush3.bf16.msra.mxu1 %v3321_v19 }
 0x95a   :  { %3089 = vmatprep.subr.bf16.mxu1 %v3356_v0 }
 0x95c   :  { %3060 = vmatpush3.bf16.msra.mxu0 %v3309_v28 }
 0x95d   :  { %3061 = vmatprep.subr.bf16.mxu0 %v3356_v0  ;;  %3090 = vmatpush3.bf16.msra.mxu1 %v3322_v20 }
 0x95e   :  { %3091 = vmatprep.subr.bf16.mxu1 %v3356_v0 }
 0x960   :  { %3062 = vmatpush3.bf16.msra.mxu0 %v3310_v53 }
 0x961   :  { %3063 = vmatprep.subr.bf16.mxu0 %v3356_v0  ;;  %3092 = vmatpush3.bf16.msra.mxu1 %v3323_v21 }
 0x964   :  { %3064 = vmatpush3.bf16.msra.mxu0 %v3311_v29 }
 0x965   :  { %3065 = vmatprep.subr.bf16.mxu0 %v3356_v0 }
 0x968   :  { %3066 = vmatpush3.bf16.msra.mxu0 %v3312_v55 }
 0x969   :  { %3067 = vmatprep.subr.bf16.mxu0 %v3356_v0 }
 0x96c   :  { %3068 = vmatpush3.bf16.msra.mxu0 %v3313_v30 }
 0x96d   :  { %3069 = vmatprep.subr.bf16.mxu0 %v3356_v0 }
 0x970   :  { %3070 = vmatpush3.bf16.msra.mxu0 %v3314_v31 }
 0x971   :  { %3071 = vmatprep.subr.bf16.mxu0 %v3356_v0 }
 0x974   :  { %3072 = vmatpush3.bf16.msra.mxu0 %v3315_v32 }
 0xa2a   :  { %v2953_v33 = vpop.f32.mrb[20].mxu0 }
 0xa2b   :  { %v2954_v35 = vpop.f32.mrb[21].mxu0 }
 0xa2c   :  { %v2955_v36 = vadd.f32 %v2954_v35, %v2953_v33  ;;  %v2956_v37 = vpop.f32.mrb[22].mxu0 }
 0xa2d   :  { %v2957_v38 = vpop.f32.mrb[23].mxu0 }
 0xa2e   :  { %v2128_v39 = vadd.f32 %v2955_v36, %v2810_v34  ;;  %v2958_v40 = vadd.f32 %v2957_v38, %v2956_v37 }
 0xa30   :  { %v2136_v42 = vmul.f32 0.2, %v2128_v39  ;;  %v2131_v41 = vadd.f32 %v2958_v40, %v2810_v34  ;;  %vm2134_vm0 = vcmp.ge.f32.partialorder %v2128_v39, 0.0 }
 0xa32   :  { %vm2135_vm10 = vcmp.ge.f32.partialorder %v2131_v41, 0.0  ;;  %v2137_v43 = vmul.f32 0.2, %v2131_v41  ;;  %v2138_v44 = vsel %vm2134_vm0, %v2128_v39, %v2136_v42 }
 0xa33   :  { %v2149_v47 = vmul.f32 %v2138_v44, %v2138_v44 }
 0xa34   :  { %v2139_v45 = vsel %vm2135_vm10, %v2131_v41, %v2137_v43 }
 0xa35   :  { %v2141_v46 = vmul.f32 0.0, %v2139_v45 }
 0xa37   :  { %v2142_v48 = vadd.f32 %v2141_v46, %v2138_v44  ;;  %v2150_v49 = vmul.f32 %v2141_v46, %v2141_v46 }
 0xa39   :  { %v2143_v50 = vrot.slane %v2142_v48, 4  ;;  %v2151_v51 = vadd.f32 %v2150_v49, %v2149_v47 }
 0xa3b   :  { %v2144_v52 = vadd.f32 %v2143_v50, %v2142_v48  ;;  %v2152_v54 = vrot.slane %v2151_v51, 4 }
 0xa3d   :  { %v2145_v56 = vrot.slane %v2144_v52, 2  ;;  %v2153_v57 = vadd.f32 %v2152_v54, %v2151_v51 }
 0xa3f   :  { %v2146_v58 = vadd.f32 %v2145_v56, %v2144_v52  ;;  %v2154_v59 = vrot.slane %v2153_v57, 2 }
 0xa41   :  { %v2147_v60 = vrot.slane %v2146_v58, 1  ;;  %v2155_v61 = vadd.f32 %v2154_v59, %v2153_v57 }
 0xa43   :  { %v2156_v62 = vrot.slane %v2155_v61, 1  ;;  %v2148_v63 = vadd.f32 %v2147_v60, %v2146_v58 }
 0xa45   :  { %v2157_v1 = vadd.f32 %v2156_v62, %v2155_v61  ;;  %v2158_v2 = vmul.f32 0.125, %v2148_v63  ;;  %v2870_v61 = vld [vmem:[%s4042_s2 + $0x16] ss:$0 sm:$0xff] }
 0xa47   :  { %v2159_v3 = vmul.f32 0.125, %v2157_v1  ;;  %v2160_v4 = vmul.f32 %v2158_v2, %v2158_v2  ;;  %v2163_v5 = vsub.f32 %v2138_v44, %v2158_v2  ;;  %v2164_v6 = vsub.f32 %v2141_v46, %v2158_v2 }
 0xa49   :  { %v2161_v8 = vsub.f32 %v2159_v3, %v2160_v4 }
 0xa4b   :  { %v2162_v7 = vmax.f32 %v2161_v8, 0.0 }
 0xa4d   :  { %v2165_v9 = vadd.f32 1e-05, %v2162_v7 }
 0xa4f   :  { %3352 = vrsqrt.f32 %v2165_v9 }
 0xa59   :  { %v3353_v10 = vpop.eup %3352 }
 0xa5a   :  { %v2167_v11 = vmul.f32 %v3353_v10, %v2163_v5  ;;  %v2168_v12 = vmul.f32 %v3353_v10, %v2164_v6 }
 0xa5c   :  { %v2188_v13 = vpack.c.bf16 %v2168_v12, %v2167_v11 }
 0xa5e   :  { %3074 = vmatmul.mubr.bf16.vlgmr.msra.gmra.mrb[24].mxu0 %v2188_v13 }
 0xb31   :  { %v2277_v23 = vpop.f32.mrb[24].mxu0 }
 0xb32   :  { %v2278_v24 = vadd.f32 %v2844_v22, %v2277_v23  ;;  %v3075_v25 = vpop.f32.mrb[25].mxu0 }
 0xb33   :  { %v2280_v26 = vpop.f32.mrb[26].mxu0 }
 0xb34   :  { %v2286_v27 = vmul.f32 0.2, %v2278_v24  ;;  %v2281_v28 = vadd.f32 %v2844_v22, %v2280_v26  ;;  %v3076_v53 = vpop.f32.mrb[27].mxu0  ;;  %vm2284_vm11 = vcmp.ge.f32.partialorder %v2278_v24, 0.0 }
 0xb36   :  { %vm2285_vm12 = vcmp.ge.f32.partialorder %v2281_v28, 0.0  ;;  %v2287_v29 = vmul.f32 0.2, %v2281_v28  ;;  %v2288_v55 = vsel %vm2284_vm11, %v2278_v24, %v2286_v27 }
 0xb37   :  { %v2299_v32 = vmul.f32 %v2288_v55, %v2288_v55 }
 0xb38   :  { %v2289_v30 = vsel %vm2285_vm12, %v2281_v28, %v2287_v29 }
 0xb39   :  { %v2291_v31 = vmul.f32 0.0, %v2289_v30 }
 0xb3b   :  { %v2292_v0 = vadd.f32 %v2291_v31, %v2288_v55  ;;  %v2300_v33 = vmul.f32 %v2291_v31, %v2291_v31 }
 0xb3d   :  { %v2293_v34 = vrot.slane %v2292_v0, 4  ;;  %v2301_v35 = vadd.f32 %v2300_v33, %v2299_v32 }
 0xb3f   :  { %v2294_v36 = vadd.f32 %v2293_v34, %v2292_v0  ;;  %v2302_v37 = vrot.slane %v2301_v35, 4 }
 0xb41   :  { %v2295_v38 = vrot.slane %v2294_v36, 2  ;;  %v2303_v39 = vadd.f32 %v2302_v37, %v2301_v35 }
 0xb43   :  { %v2296_v40 = vadd.f32 %v2295_v38, %v2294_v36  ;;  %v2304_v42 = vrot.slane %v2303_v39, 2 }
 0xb45   :  { %v2297_v41 = vrot.slane %v2296_v40, 1  ;;  %v2305_v43 = vadd.f32 %v2304_v42, %v2303_v39 }
 0xb47   :  { %v2298_v44 = vadd.f32 %v2297_v41, %v2296_v40  ;;  %v2306_v45 = vrot.slane %v2305_v43, 1 }
 0xb49   :  { %v2307_v46 = vadd.f32 %v2306_v45, %v2305_v43  ;;  %v2308_v47 = vmul.f32 0.125, %v2298_v44 }
 0xb4b   :  { %v2309_v48 = vmul.f32 0.125, %v2307_v46  ;;  %v2310_v49 = vmul.f32 %v2308_v47, %v2308_v47  ;;  %v2314_v50 = vsub.f32 %v2291_v31, %v2308_v47  ;;  %v2313_v51 = vsub.f32 %v2288_v55, %v2308_v47 }
 0xb4d   :  { %v2311_v52 = vsub.f32 %v2309_v48, %v2310_v49 }
 0xb4f   :  { %v2312_v54 = vmax.f32 %v2311_v52, 0.0 }
 0xb51   :  { %v2315_v56 = vadd.f32 1e-05, %v2312_v54 }
 0xb53   :  { %3354 = vrsqrt.f32 %v2315_v56 }
 0xb5d   :  { %v3355_v57 = vpop.eup %3354 }
 0xb5e   :  { %v2317_v58 = vmul.f32 %v3355_v57, %v2313_v51  ;;  %v2318_v59 = vmul.f32 %v3355_v57, %v2314_v50 }
 0xb60   :  { %v2338_v60 = vpack.c.bf16 %v2318_v59, %v2317_v58 }
 0xb62   :  { %3094 = vmatmul.mubr.bf16.vlgmr.msra.gmra.mrb[16].mxu1 %v2338_v60 }
 0xc35   :  { %v2427_v62 = vpop.f32.mrb[16].mxu1 }
 0xc36   :  { %v2428_v63 = vadd.f32 %v2870_v61, %v2427_v62  ;;  %v3095_v1 = vpop.f32.mrb[17].mxu1 }
 0xc37   :  { %v2430_v2 = vpop.f32.mrb[18].mxu1 }
 0xc38   :  { %2434 = vst [vmem:[%s4044_s4] sm:$0xff] %v2428_v63  ;;  %v2431_v3 = vadd.f32 %v2870_v61, %v2430_v2  ;;  %v3096_v4 = vpop.f32.mrb[19].mxu1 }
 0xc3a   :  { %2435 = vst [vmem:[%s4044_s4 + $0x8] sm:$0xff] %v2431_v3 }

</bundles_post_ra>
